<compile_context>
chip_gen: v7x
topology: tpu7x:2x2x1
jax: 0.10.0
libtpu: 0.0.40
codegen_flags: <defaults>
</compile_context>

<pallas_src>
import functools

import jax
import jax.numpy as jnp
import numpy as np
from jax.experimental import pallas as pl
from jax.experimental.pallas import tpu as pltpu

_LRELU_SLOPE = 0.2
_SQRT2 = np.float32(np.sqrt(2.0))
_SQRT_HALF = np.float32(np.sqrt(0.5))


def _style_block_kernel(w_ref, x_ref, affw_ref, affb_ref,
                        w0_ref, w0sq_ref, b0_ref,
                        w1_ref, w1sq_ref, b1_ref,
                        wskip_ref, out_ref, *, H, W, tb, cin, cmid, cout):
    f32 = jnp.float32
    S = H * W
    pad = 8  # sublane-aligned halo, >= W + 1

    x = x_ref[...]                     # [tb, S, cin]   (channels-last, S = H*W)
    w_lat = w_ref[...]                 # [tb, Wd]

    # ---- spatial masks for the flattened-im2col taps (shared by both convs) ---
    col_idx = jax.lax.broadcasted_iota(jnp.int32, (1, S, 1), 1) % W
    mask_l = (col_idx >= 1).astype(f32)        # tap dw == -1 valid
    mask_r = (col_idx <= W - 2).astype(f32)    # tap dw == +1 valid

    def conv3x3(xm, w_col):
        """xm: [tb, S, C]; w_col: [9*C, Co]  ->  [tb, S, Co] via one MXU matmul."""
        C = xm.shape[-1]
        zpad = jnp.zeros((tb, pad, C), f32)
        xp = jnp.concatenate([zpad, xm, zpad], axis=1)        # [tb, S + 2*pad, C]
        taps = []
        for dh in (-1, 0, 1):
            for dw in (-1, 0, 1):
                off = dh * W + dw
                # zero padding along the flattened spatial axis handles the
                # h out-of-range taps; the w-mask handles row wrap-around.
                sl = xm if off == 0 else xp[:, pad + off: pad + off + S, :]
                if dw == -1:
                    sl = sl * mask_l
                elif dw == 1:
                    sl = sl * mask_r
                taps.append(sl)
        colm = jnp.concatenate(taps, axis=-1).reshape(tb * S, 9 * C)
        out = jnp.dot(colm, w_col, preferred_element_type=f32)
        return out.reshape(tb, S, w_col.shape[-1])

    # ---- both style affines in one matmul (weight gain folded in wrapper) -----
    styles = jnp.dot(w_lat, affw_ref[...], preferred_element_type=f32) + affb_ref[...]
    styles0 = styles[:, :cin]          # [tb, cin]
    styles1 = styles[:, cin:]          # [tb, cmid]

    # ---- demodulation: d[b,o] = rsqrt(sum_i s[b,i]^2 * sum_k W[o,i,k]^2 + eps) --
    d0 = jax.lax.rsqrt(jnp.dot(styles0 * styles0, w0sq_ref[...],
                               preferred_element_type=f32) + 1e-8)   # [tb, cmid]
    d1 = jax.lax.rsqrt(jnp.dot(styles1 * styles1, w1sq_ref[...],
                               preferred_element_type=f32) + 1e-8)   # [tb, cout]

    # ---- skip path: 1x1 conv (weight gain folded), no bias, gain sqrt(0.5) ----
    y_skip = jnp.dot(x.reshape(tb * S, cin), wskip_ref[...],
                     preferred_element_type=f32).reshape(tb, S, cout) * _SQRT_HALF

    # ---- conv0: modulate -> 3x3 conv -> demod -> bias -> lrelu * sqrt(2) ------
    h0 = conv3x3(x * styles0[:, None, :], w0_ref[...])
    h0 = h0 * d0[:, None, :] + b0_ref[...][None]
    h0 = jnp.where(h0 >= 0, h0, _LRELU_SLOPE * h0) * _SQRT2

    # ---- conv1: overall activation gain sqrt(2)*sqrt(0.5) == 1 ----------------
    h1 = conv3x3(h0 * styles1[:, None, :], w1_ref[...])
    h1 = h1 * d1[:, None, :] + b1_ref[...][None]
    h1 = jnp.where(h1 >= 0, h1, _LRELU_SLOPE * h1)

    # ---- residual add ----------------------------------------------------------
    out_ref[...] = (h1 + y_skip).astype(out_ref.dtype)


def style_enc_generator_block(x, w, params, *, batch_tile=8):
    """x: [B, Cin, H, W] (NCHW), w: [B, Wd]. Returns [B, Cout, H, W]."""
    f32 = jnp.float32
    B, Cin, H, W_sp = x.shape
    S = H * W_sp
    Wd = w.shape[1]
    conv0_w = params["conv0_weight"].astype(f32)   # [Cmid, Cin, 3, 3]
    conv1_w = params["conv1_weight"].astype(f32)   # [Cout, Cmid, 3, 3]
    skip_w = params["skip_weight"].astype(f32)     # [Cout, Cin, 1, 1]
    Cmid, Cout = conv0_w.shape[0], conv1_w.shape[0]

    # ---- parameter glue (constant reshapes / gain folding, done once) ---------
    a0w = (params["affine0_weight"].astype(f32) * (1.0 / np.sqrt(Wd))).T   # [Wd, Cin]
    a1w = (params["affine1_weight"].astype(f32) * (1.0 / np.sqrt(Wd))).T   # [Wd, Cmid]
    aff_w = jnp.concatenate([a0w, a1w], axis=1)                            # [Wd, Cin+Cmid]
    aff_b = jnp.concatenate([params["affine0_bias"].astype(f32),
                             params["affine1_bias"].astype(f32)]).reshape(1, Cin + Cmid)

    # conv weights in im2col layout [(kh,kw,Cin), Cout], tap order matches kernel
    w0_col = jnp.transpose(conv0_w, (2, 3, 1, 0)).reshape(9 * Cin, Cmid)
    w1_col = jnp.transpose(conv1_w, (2, 3, 1, 0)).reshape(9 * Cmid, Cout)
    w0_sq = jnp.sum(conv0_w ** 2, axis=(2, 3)).T                           # [Cin, Cmid]
    w1_sq = jnp.sum(conv1_w ** 2, axis=(2, 3)).T                           # [Cmid, Cout]
    b0 = params["conv0_bias"].reshape(1, Cmid).astype(f32)
    b1 = params["conv1_bias"].reshape(1, Cout).astype(f32)
    wskip = (skip_w[:, :, 0, 0] * (1.0 / np.sqrt(Cin))).T                  # [Cin, Cout]

    # ---- activation glue: NCHW -> [B, H*W, C] (channels on the lane axis) -----
    x_l = jnp.transpose(x.astype(f32), (0, 2, 3, 1)).reshape(B, S, Cin)
    w_l = w.astype(f32)

    # ---- batch tiling: TB elements per grid step (grid collapses for small B) -
    tb = int(min(batch_tile, B))
    n_tiles = pl.cdiv(B, tb)
    B_pad = n_tiles * tb
    if B_pad != B:
        x_l = jnp.pad(x_l, ((0, B_pad - B), (0, 0), (0, 0)))
        w_l = jnp.pad(w_l, ((0, B_pad - B), (0, 0)))

    kernel = functools.partial(_style_block_kernel, H=H, W=W_sp, tb=tb,
                               cin=Cin, cmid=Cmid, cout=Cout)
    const2 = lambda i: (0, 0)

    flops = 2 * B_pad * S * (9 * Cin * Cmid + 9 * Cmid * Cout + Cin * Cout)
    bytes_accessed = 4 * (x_l.size + B_pad * S * Cout + w0_col.size + w1_col.size
                          + wskip.size + w0_sq.size + w1_sq.size + aff_w.size)

    out = pl.pallas_call(
        kernel,
        out_shape=jax.ShapeDtypeStruct((B_pad, S, Cout), f32),
        grid_spec=pltpu.PrefetchScalarGridSpec(
            num_scalar_prefetch=0,
            grid=(n_tiles,),
            in_specs=[
                pl.BlockSpec((tb, Wd), lambda i: (i, 0)),            # latent w
                pl.BlockSpec((tb, S, Cin), lambda i: (i, 0, 0)),     # x
                pl.BlockSpec((Wd, Cin + Cmid), const2),              # fused affine weight
                pl.BlockSpec((1, Cin + Cmid), const2),               # fused affine bias
                pl.BlockSpec((9 * Cin, Cmid), const2),               # conv0 weight (im2col)
                pl.BlockSpec((Cin, Cmid), const2),                   # conv0 sum_k W^2
                pl.BlockSpec((1, Cmid), const2),                     # conv0 bias
                pl.BlockSpec((9 * Cmid, Cout), const2),              # conv1 weight (im2col)
                pl.BlockSpec((Cmid, Cout), const2),                  # conv1 sum_k W^2
                pl.BlockSpec((1, Cout), const2),                     # conv1 bias
                pl.BlockSpec((Cin, Cout), const2),                   # skip weight
            ],
            out_specs=pl.BlockSpec((tb, S, Cout), lambda i: (i, 0, 0)),
        ),
        compiler_params=pltpu.CompilerParams(
            dimension_semantics=("parallel",)),
        cost_estimate=pl.CostEstimate(
            flops=int(flops), transcendentals=0, bytes_accessed=int(bytes_accessed)),
    )(w_l, x_l, aff_w, aff_b, w0_col, w0_sq, b0, w1_col, w1_sq, b1, wskip)

    out = out[:B].reshape(B, H, W_sp, Cout)
    return jnp.transpose(out, (0, 3, 1, 2))


def _reference(x, w, params):
    """Pure-JAX reference mirroring the PyTorch StyleEncGeneratorBlock forward."""
    f32 = jnp.float32
    hi = jax.lax.Precision.HIGHEST
    x = x.astype(f32)
    w = w.astype(f32)
    Cin = x.shape[1]

    def affine(wt, a_w, a_b):
        wd = a_w.shape[1]
        return jnp.matmul(wt, (a_w * (1.0 / np.sqrt(wd))).T, precision=hi) + a_b

    def synth_layer(xi, wt, conv_w, a_w, a_b, bias, gain):
        styles = affine(wt, a_w, a_b)                                    # [B, I]
        wmod = conv_w[None] * styles[:, None, :, None, None]             # [B, O, I, 3, 3]
        dcoefs = jax.lax.rsqrt(jnp.sum(wmod * wmod, axis=(2, 3, 4)) + 1e-8)
        xm = xi * styles[:, :, None, None]
        y = jax.lax.conv_general_dilated(
            xm, conv_w, window_strides=(1, 1), padding=((1, 1), (1, 1)),
            dimension_numbers=("NCHW", "OIHW", "NCHW"), precision=hi)
        y = y * dcoefs[:, :, None, None] + bias[None, :, None, None]
        y = jnp.where(y >= 0, y, _LRELU_SLOPE * y) * (np.sqrt(2.0) * gain)
        return y

    skip_w = params["skip_weight"].astype(f32) * (1.0 / np.sqrt(Cin))
    y = jax.lax.conv_general_dilated(
        x, skip_w, window_strides=(1, 1), padding=((0, 0), (0, 0)),
        dimension_numbers=("NCHW", "OIHW", "NCHW"), precision=hi) * np.sqrt(0.5)

    h = synth_layer(x, w, params["conv0_weight"].astype(f32),
                    params["affine0_weight"].astype(f32),
                    params["affine0_bias"].astype(f32),
                    params["conv0_bias"].astype(f32), gain=1.0)
    h = synth_layer(h, w, params["conv1_weight"].astype(f32),
                    params["affine1_weight"].astype(f32),
                    params["affine1_bias"].astype(f32),
                    params["conv1_bias"].astype(f32), gain=np.sqrt(0.5))
    return y + h


if __name__ == "__main__":
    # Small shapes consistent with the module: resolution=4 (H=W=4), channels
    # scaled down 512 -> 128 (kept lane-dense), w_dim scaled 512 -> 32, batch 2.
    B, CIN, CMID, COUT, H, W_SP, WD = 2, 128, 128, 128, 4, 4, 32

    key = jax.random.PRNGKey(0)
    ks = jax.random.split(key, 11)

    x = jax.random.normal(ks[0], (B, CIN, H, W_SP), dtype=jnp.float32)
    w = jax.random.normal(ks[1], (B, WD), dtype=jnp.float32)

    params = {
        "affine0_weight": jax.random.normal(ks[2], (CIN, WD), dtype=jnp.float32),
        "affine0_bias": 1.0 + 0.1 * jax.random.normal(ks[3], (CIN,), dtype=jnp.float32),
        "conv0_weight": jax.random.normal(ks[4], (CMID, CIN, 3, 3), dtype=jnp.float32),
        "conv0_bias": 0.1 * jax.random.normal(ks[5], (CMID,), dtype=jnp.float32),
        "affine1_weight": jax.random.normal(ks[6], (CMID, WD), dtype=jnp.float32),
        "affine1_bias": 1.0 + 0.1 * jax.random.normal(ks[7], (CMID,), dtype=jnp.float32),
        "conv1_weight": jax.random.normal(ks[8], (COUT, CMID, 3, 3), dtype=jnp.float32),
        "conv1_bias": 0.1 * jax.random.normal(ks[9], (COUT,), dtype=jnp.float32),
        "skip_weight": jax.random.normal(ks[10], (COUT, CIN, 1, 1), dtype=jnp.float32),
    }

    out = style_enc_generator_block(x, w, params)
    out = jax.block_until_ready(out)

    ref = jax.block_until_ready(_reference(x, w, params))
    np.testing.assert_allclose(np.asarray(out), np.asarray(ref), rtol=1e-2, atol=1e-2)
    print("KERNEL_OK")
</pallas_src>

<mosaic_0001>
module attributes {stable_mosaic.version = 11 : i64} {
  func.func @_style_block_kernel(%arg0: i32, %arg1: memref<2x32xf32, #tpu.memory_space<vmem>>, %arg2: memref<2x16x128xf32, #tpu.memory_space<vmem>>, %arg3: memref<32x256xf32, #tpu.memory_space<vmem>>, %arg4: memref<1x256xf32, #tpu.memory_space<vmem>>, %arg5: memref<1152x128xf32, #tpu.memory_space<vmem>>, %arg6: memref<128x128xf32, #tpu.memory_space<vmem>>, %arg7: memref<1x128xf32, #tpu.memory_space<vmem>>, %arg8: memref<1152x128xf32, #tpu.memory_space<vmem>>, %arg9: memref<128x128xf32, #tpu.memory_space<vmem>>, %arg10: memref<1x128xf32, #tpu.memory_space<vmem>>, %arg11: memref<128x128xf32, #tpu.memory_space<vmem>>, %arg12: memref<2x16x128xf32, #tpu.memory_space<vmem>>) attributes {dimension_semantics = [#tpu.dimension_semantics<parallel>], iteration_bounds = array<i64: 1>, scalar_prefetch = 0 : i64, scratch_operands = 0 : i64, tpu.core_type = #tpu.core_type<tc>, window_params = [{transform_indices = @transform_0, window_bounds = array<i64: 2, 32>}, {transform_indices = @transform_1, window_bounds = array<i64: 2, 16, 128>}, {pipeline_mode = #tpu.pipeline_mode<synchronous>, transform_indices = @transform_2, window_bounds = array<i64: 32, 256>}, {pipeline_mode = #tpu.pipeline_mode<synchronous>, transform_indices = @transform_3, window_bounds = array<i64: 1, 256>}, {pipeline_mode = #tpu.pipeline_mode<synchronous>, transform_indices = @transform_4, window_bounds = array<i64: 1152, 128>}, {pipeline_mode = #tpu.pipeline_mode<synchronous>, transform_indices = @transform_5, window_bounds = array<i64: 128, 128>}, {pipeline_mode = #tpu.pipeline_mode<synchronous>, transform_indices = @transform_6, window_bounds = array<i64: 1, 128>}, {pipeline_mode = #tpu.pipeline_mode<synchronous>, transform_indices = @transform_7, window_bounds = array<i64: 1152, 128>}, {pipeline_mode = #tpu.pipeline_mode<synchronous>, transform_indices = @transform_8, window_bounds = array<i64: 128, 128>}, {pipeline_mode = #tpu.pipeline_mode<synchronous>, transform_indices = @transform_9, window_bounds = array<i64: 1, 128>}, {pipeline_mode = #tpu.pipeline_mode<synchronous>, transform_indices = @transform_10, window_bounds = array<i64: 128, 128>}, {transform_indices = @transform_11, window_bounds = array<i64: 2, 16, 128>}]} {
    %c0 = arith.constant 0 : index
    %c0_0 = arith.constant 0 : index
    %c0_1 = arith.constant 0 : index
    %0 = vector.load %arg2[%c0, %c0_0, %c0_1] : memref<2x16x128xf32, #tpu.memory_space<vmem>>, vector<2x16x128xf32>
    %c0_2 = arith.constant 0 : index
    %c0_3 = arith.constant 0 : index
    %1 = vector.load %arg1[%c0_2, %c0_3] : memref<2x32xf32, #tpu.memory_space<vmem>>, vector<2x32xf32>
    %2 = tpu.iota {dimensions = array<i32: 1>} : vector<1x16x1xi32>
    %c4_i32 = arith.constant 4 : i32
    %c0_i32 = arith.constant 0 : i32
    %3 = arith.cmpi eq, %c4_i32, %c0_i32 : i32
    %c1_i32 = arith.constant 1 : i32
    %4 = arith.select %3, %c1_i32, %c4_i32 : i32
    %5 = vector.broadcast %4 : i32 to vector<1x16x1xi32>
    %6 = arith.remsi %2, %5 : vector<1x16x1xi32>
    %c0_i32_4 = arith.constant 0 : i32
    %7 = vector.broadcast %c0_i32_4 : i32 to vector<1x16x1xi32>
    %8 = arith.cmpi ne, %6, %7 : vector<1x16x1xi32>
    %c0_i32_5 = arith.constant 0 : i32
    %9 = vector.broadcast %c0_i32_5 : i32 to vector<1x16x1xi32>
    %10 = arith.cmpi slt, %6, %9 : vector<1x16x1xi32>
    %c0_i32_6 = arith.constant 0 : i32
    %11 = arith.cmpi slt, %4, %c0_i32_6 : i32
    %12 = vector.broadcast %11 : i1 to vector<1x16x1xi1>
    %13 = vector.broadcast %12 : vector<1x16x1xi1> to vector<1x16x1xi1>
    %14 = arith.xori %10, %13 : vector<1x16x1xi1>
    %15 = arith.andi %14, %8 : vector<1x16x1xi1>
    %16 = vector.broadcast %4 : i32 to vector<1x16x1xi32>
    %17 = arith.addi %6, %16 : vector<1x16x1xi32>
    %18 = arith.select %15, %17, %6 : vector<1x16x1xi1>, vector<1x16x1xi32>
    %c1_i32_7 = arith.constant 1 : i32
    %19 = vector.broadcast %c1_i32_7 : i32 to vector<1x16x1xi32>
    %20 = arith.cmpi sge, %18, %19 : vector<1x16x1xi32>
    %21 = arith.extui %20 : vector<1x16x1xi1> to vector<1x16x1xi32>
    %22 = arith.sitofp %21 : vector<1x16x1xi32> to vector<1x16x1xf32>
    %c2_i32 = arith.constant 2 : i32
    %23 = vector.broadcast %c2_i32 : i32 to vector<1x16x1xi32>
    %24 = arith.cmpi sle, %18, %23 : vector<1x16x1xi32>
    %25 = arith.extui %24 : vector<1x16x1xi1> to vector<1x16x1xi32>
    %26 = arith.sitofp %25 : vector<1x16x1xi32> to vector<1x16x1xf32>
    %c0_8 = arith.constant 0 : index
    %c0_9 = arith.constant 0 : index
    %27 = vector.load %arg3[%c0_8, %c0_9] : memref<32x256xf32, #tpu.memory_space<vmem>>, vector<32x256xf32>
    %cst = arith.constant dense<0.000000e+00> : vector<2x256xf32>
    %28 = tpu.matmul %1, %27, %cst {dimension_numbers = #tpu.dot_dimension_numbers<[1], [0], [0], [1], [0, 0, 1, 1], [], []>} : vector<2x32xf32>, vector<32x256xf32>, vector<2x256xf32> -> vector<2x256xf32>
    %c0_10 = arith.constant 0 : index
    %c0_11 = arith.constant 0 : index
    %29 = vector.load %arg4[%c0_10, %c0_11] : memref<1x256xf32, #tpu.memory_space<vmem>>, vector<1x256xf32>
    %30 = vector.broadcast %29 : vector<1x256xf32> to vector<2x256xf32>
    %31 = arith.addf %28, %30 : vector<2x256xf32>
    %32 = vector.extract_strided_slice %31 {offsets = [0, 0], sizes = [2, 128], strides = [1, 1]} : vector<2x256xf32> to vector<2x128xf32>
    %33 = vector.extract_strided_slice %31 {offsets = [0, 128], sizes = [2, 128], strides = [1, 1]} : vector<2x256xf32> to vector<2x128xf32>
    %34 = arith.mulf %32, %32 : vector<2x128xf32>
    %c0_12 = arith.constant 0 : index
    %c0_13 = arith.constant 0 : index
    %35 = vector.load %arg6[%c0_12, %c0_13] : memref<128x128xf32, #tpu.memory_space<vmem>>, vector<128x128xf32>
    %cst_14 = arith.constant dense<0.000000e+00> : vector<2x128xf32>
    %36 = tpu.matmul %34, %35, %cst_14 {dimension_numbers = #tpu.dot_dimension_numbers<[1], [0], [0], [1], [0, 0, 1, 1], [], []>} : vector<2x128xf32>, vector<128x128xf32>, vector<2x128xf32> -> vector<2x128xf32>
    %cst_15 = arith.constant 9.99999993E-9 : f32
    %37 = vector.broadcast %cst_15 : f32 to vector<2x128xf32>
    %38 = arith.addf %36, %37 : vector<2x128xf32>
    %39 = math.rsqrt %38 : vector<2x128xf32>
    %40 = arith.mulf %33, %33 : vector<2x128xf32>
    %c0_16 = arith.constant 0 : index
    %c0_17 = arith.constant 0 : index
    %41 = vector.load %arg9[%c0_16, %c0_17] : memref<128x128xf32, #tpu.memory_space<vmem>>, vector<128x128xf32>
    %cst_18 = arith.constant dense<0.000000e+00> : vector<2x128xf32>
    %42 = tpu.matmul %40, %41, %cst_18 {dimension_numbers = #tpu.dot_dimension_numbers<[1], [0], [0], [1], [0, 0, 1, 1], [], []>} : vector<2x128xf32>, vector<128x128xf32>, vector<2x128xf32> -> vector<2x128xf32>
    %cst_19 = arith.constant 9.99999993E-9 : f32
    %43 = vector.broadcast %cst_19 : f32 to vector<2x128xf32>
    %44 = arith.addf %42, %43 : vector<2x128xf32>
    %45 = math.rsqrt %44 : vector<2x128xf32>
    %46 = vector.shape_cast %0 : vector<2x16x128xf32> to vector<32x128xf32>
    %c0_20 = arith.constant 0 : index
    %c0_21 = arith.constant 0 : index
    %47 = vector.load %arg11[%c0_20, %c0_21] : memref<128x128xf32, #tpu.memory_space<vmem>>, vector<128x128xf32>
    %cst_22 = arith.constant dense<0.000000e+00> : vector<32x128xf32>
    %48 = tpu.matmul %46, %47, %cst_22 {dimension_numbers = #tpu.dot_dimension_numbers<[1], [0], [0], [1], [0, 0, 1, 1], [], []>} : vector<32x128xf32>, vector<128x128xf32>, vector<32x128xf32> -> vector<32x128xf32>
    %49 = vector.shape_cast %48 : vector<32x128xf32> to vector<2x16x128xf32>
    %cst_23 = arith.constant 0.707106769 : f32
    %50 = vector.broadcast %cst_23 : f32 to vector<2x16x128xf32>
    %51 = arith.mulf %49, %50 : vector<2x16x128xf32>
    %52 = vector.shape_cast %32 : vector<2x128xf32> to vector<2x1x128xf32>
    %53 = vector.broadcast %52 : vector<2x1x128xf32> to vector<2x16x128xf32>
    %54 = arith.mulf %0, %53 : vector<2x16x128xf32>
    %c0_24 = arith.constant 0 : index
    %c0_25 = arith.constant 0 : index
    %55 = vector.load %arg5[%c0_24, %c0_25] : memref<1152x128xf32, #tpu.memory_space<vmem>>, vector<1152x128xf32>
    %cst_26 = arith.constant 0.000000e+00 : f32
    %56 = vector.broadcast %cst_26 : f32 to vector<2x8x128xf32>
    %57 = tpu.concatenate %56, %54, %56 in 1 : vector<2x8x128xf32>, vector<2x16x128xf32>, vector<2x8x128xf32> -> vector<2x32x128xf32>
    %58 = vector.extract_strided_slice %57 {offsets = [0, 3, 0], sizes = [2, 16, 128], strides = [1, 1, 1]} : vector<2x32x128xf32> to vector<2x16x128xf32>
    %59 = vector.broadcast %22 : vector<1x16x1xf32> to vector<2x16x128xf32>
    %60 = arith.mulf %58, %59 : vector<2x16x128xf32>
    %61 = vector.extract_strided_slice %57 {offsets = [0, 4, 0], sizes = [2, 16, 128], strides = [1, 1, 1]} : vector<2x32x128xf32> to vector<2x16x128xf32>
    %62 = vector.extract_strided_slice %57 {offsets = [0, 5, 0], sizes = [2, 16, 128], strides = [1, 1, 1]} : vector<2x32x128xf32> to vector<2x16x128xf32>
    %63 = vector.broadcast %26 : vector<1x16x1xf32> to vector<2x16x128xf32>
    %64 = arith.mulf %62, %63 : vector<2x16x128xf32>
    %65 = vector.extract_strided_slice %57 {offsets = [0, 7, 0], sizes = [2, 16, 128], strides = [1, 1, 1]} : vector<2x32x128xf32> to vector<2x16x128xf32>
    %66 = vector.broadcast %22 : vector<1x16x1xf32> to vector<2x16x128xf32>
    %67 = arith.mulf %65, %66 : vector<2x16x128xf32>
    %68 = vector.extract_strided_slice %57 {offsets = [0, 9, 0], sizes = [2, 16, 128], strides = [1, 1, 1]} : vector<2x32x128xf32> to vector<2x16x128xf32>
    %69 = vector.broadcast %26 : vector<1x16x1xf32> to vector<2x16x128xf32>
    %70 = arith.mulf %68, %69 : vector<2x16x128xf32>
    %71 = vector.extract_strided_slice %57 {offsets = [0, 11, 0], sizes = [2, 16, 128], strides = [1, 1, 1]} : vector<2x32x128xf32> to vector<2x16x128xf32>
    %72 = vector.broadcast %22 : vector<1x16x1xf32> to vector<2x16x128xf32>
    %73 = arith.mulf %71, %72 : vector<2x16x128xf32>
    %74 = vector.extract_strided_slice %57 {offsets = [0, 12, 0], sizes = [2, 16, 128], strides = [1, 1, 1]} : vector<2x32x128xf32> to vector<2x16x128xf32>
    %75 = vector.extract_strided_slice %57 {offsets = [0, 13, 0], sizes = [2, 16, 128], strides = [1, 1, 1]} : vector<2x32x128xf32> to vector<2x16x128xf32>
    %76 = vector.broadcast %26 : vector<1x16x1xf32> to vector<2x16x128xf32>
    %77 = arith.mulf %75, %76 : vector<2x16x128xf32>
    %78 = tpu.concatenate %60, %61, %64, %67, %54, %70, %73, %74, %77 in 2 : vector<2x16x128xf32>, vector<2x16x128xf32>, vector<2x16x128xf32>, vector<2x16x128xf32>, vector<2x16x128xf32>, vector<2x16x128xf32>, vector<2x16x128xf32>, vector<2x16x128xf32>, vector<2x16x128xf32> -> vector<2x16x1152xf32>
    %79 = vector.shape_cast %78 : vector<2x16x1152xf32> to vector<32x1152xf32>
    %cst_27 = arith.constant dense<0.000000e+00> : vector<32x128xf32>
    %80 = tpu.matmul %79, %55, %cst_27 {dimension_numbers = #tpu.dot_dimension_numbers<[1], [0], [0], [1], [0, 0, 1, 1], [], []>} : vector<32x1152xf32>, vector<1152x128xf32>, vector<32x128xf32> -> vector<32x128xf32>
    %81 = vector.shape_cast %80 : vector<32x128xf32> to vector<2x16x128xf32>
    %82 = vector.shape_cast %39 : vector<2x128xf32> to vector<2x1x128xf32>
    %83 = vector.broadcast %82 : vector<2x1x128xf32> to vector<2x16x128xf32>
    %84 = arith.mulf %81, %83 : vector<2x16x128xf32>
    %c0_28 = arith.constant 0 : index
    %c0_29 = arith.constant 0 : index
    %85 = vector.load %arg7[%c0_28, %c0_29] : memref<1x128xf32, #tpu.memory_space<vmem>>, vector<1x128xf32>
    %86 = vector.shape_cast %85 : vector<1x128xf32> to vector<1x1x128xf32>
    %87 = vector.broadcast %86 : vector<1x1x128xf32> to vector<2x16x128xf32>
    %88 = arith.addf %84, %87 : vector<2x16x128xf32>
    %cst_30 = arith.constant 0.000000e+00 : f32
    %89 = vector.broadcast %cst_30 : f32 to vector<2x16x128xf32>
    %90 = arith.cmpf oge, %88, %89 : vector<2x16x128xf32>
    %cst_31 = arith.constant 2.000000e-01 : f32
    %91 = vector.broadcast %cst_31 : f32 to vector<2x16x128xf32>
    %92 = arith.mulf %91, %88 : vector<2x16x128xf32>
    %93 = arith.select %90, %88, %92 : vector<2x16x128xi1>, vector<2x16x128xf32>
    %cst_32 = arith.constant 1.41421354 : f32
    %94 = vector.broadcast %cst_32 : f32 to vector<2x16x128xf32>
    %95 = arith.mulf %93, %94 : vector<2x16x128xf32>
    %96 = vector.shape_cast %33 : vector<2x128xf32> to vector<2x1x128xf32>
    %97 = vector.broadcast %96 : vector<2x1x128xf32> to vector<2x16x128xf32>
    %98 = arith.mulf %95, %97 : vector<2x16x128xf32>
    %c0_33 = arith.constant 0 : index
    %c0_34 = arith.constant 0 : index
    %99 = vector.load %arg8[%c0_33, %c0_34] : memref<1152x128xf32, #tpu.memory_space<vmem>>, vector<1152x128xf32>
    %cst_35 = arith.constant 0.000000e+00 : f32
    %100 = vector.broadcast %cst_35 : f32 to vector<2x8x128xf32>
    %101 = tpu.concatenate %100, %98, %100 in 1 : vector<2x8x128xf32>, vector<2x16x128xf32>, vector<2x8x128xf32> -> vector<2x32x128xf32>
    %102 = vector.extract_strided_slice %101 {offsets = [0, 3, 0], sizes = [2, 16, 128], strides = [1, 1, 1]} : vector<2x32x128xf32> to vector<2x16x128xf32>
    %103 = vector.broadcast %22 : vector<1x16x1xf32> to vector<2x16x128xf32>
    %104 = arith.mulf %102, %103 : vector<2x16x128xf32>
    %105 = vector.extract_strided_slice %101 {offsets = [0, 4, 0], sizes = [2, 16, 128], strides = [1, 1, 1]} : vector<2x32x128xf32> to vector<2x16x128xf32>
    %106 = vector.extract_strided_slice %101 {offsets = [0, 5, 0], sizes = [2, 16, 128], strides = [1, 1, 1]} : vector<2x32x128xf32> to vector<2x16x128xf32>
    %107 = vector.broadcast %26 : vector<1x16x1xf32> to vector<2x16x128xf32>
    %108 = arith.mulf %106, %107 : vector<2x16x128xf32>
    %109 = vector.extract_strided_slice %101 {offsets = [0, 7, 0], sizes = [2, 16, 128], strides = [1, 1, 1]} : vector<2x32x128xf32> to vector<2x16x128xf32>
    %110 = vector.broadcast %22 : vector<1x16x1xf32> to vector<2x16x128xf32>
    %111 = arith.mulf %109, %110 : vector<2x16x128xf32>
    %112 = vector.extract_strided_slice %101 {offsets = [0, 9, 0], sizes = [2, 16, 128], strides = [1, 1, 1]} : vector<2x32x128xf32> to vector<2x16x128xf32>
    %113 = vector.broadcast %26 : vector<1x16x1xf32> to vector<2x16x128xf32>
    %114 = arith.mulf %112, %113 : vector<2x16x128xf32>
    %115 = vector.extract_strided_slice %101 {offsets = [0, 11, 0], sizes = [2, 16, 128], strides = [1, 1, 1]} : vector<2x32x128xf32> to vector<2x16x128xf32>
    %116 = vector.broadcast %22 : vector<1x16x1xf32> to vector<2x16x128xf32>
    %117 = arith.mulf %115, %116 : vector<2x16x128xf32>
    %118 = vector.extract_strided_slice %101 {offsets = [0, 12, 0], sizes = [2, 16, 128], strides = [1, 1, 1]} : vector<2x32x128xf32> to vector<2x16x128xf32>
    %119 = vector.extract_strided_slice %101 {offsets = [0, 13, 0], sizes = [2, 16, 128], strides = [1, 1, 1]} : vector<2x32x128xf32> to vector<2x16x128xf32>
    %120 = vector.broadcast %26 : vector<1x16x1xf32> to vector<2x16x128xf32>
    %121 = arith.mulf %119, %120 : vector<2x16x128xf32>
    %122 = tpu.concatenate %104, %105, %108, %111, %98, %114, %117, %118, %121 in 2 : vector<2x16x128xf32>, vector<2x16x128xf32>, vector<2x16x128xf32>, vector<2x16x128xf32>, vector<2x16x128xf32>, vector<2x16x128xf32>, vector<2x16x128xf32>, vector<2x16x128xf32>, vector<2x16x128xf32> -> vector<2x16x1152xf32>
    %123 = vector.shape_cast %122 : vector<2x16x1152xf32> to vector<32x1152xf32>
    %cst_36 = arith.constant dense<0.000000e+00> : vector<32x128xf32>
    %124 = tpu.matmul %123, %99, %cst_36 {dimension_numbers = #tpu.dot_dimension_numbers<[1], [0], [0], [1], [0, 0, 1, 1], [], []>} : vector<32x1152xf32>, vector<1152x128xf32>, vector<32x128xf32> -> vector<32x128xf32>
    %125 = vector.shape_cast %124 : vector<32x128xf32> to vector<2x16x128xf32>
    %126 = vector.shape_cast %45 : vector<2x128xf32> to vector<2x1x128xf32>
    %127 = vector.broadcast %126 : vector<2x1x128xf32> to vector<2x16x128xf32>
    %128 = arith.mulf %125, %127 : vector<2x16x128xf32>
    %c0_37 = arith.constant 0 : index
    %c0_38 = arith.constant 0 : index
    %129 = vector.load %arg10[%c0_37, %c0_38] : memref<1x128xf32, #tpu.memory_space<vmem>>, vector<1x128xf32>
    %130 = vector.shape_cast %129 : vector<1x128xf32> to vector<1x1x128xf32>
    %131 = vector.broadcast %130 : vector<1x1x128xf32> to vector<2x16x128xf32>
    %132 = arith.addf %128, %131 : vector<2x16x128xf32>
    %cst_39 = arith.constant 0.000000e+00 : f32
    %133 = vector.broadcast %cst_39 : f32 to vector<2x16x128xf32>
    %134 = arith.cmpf oge, %132, %133 : vector<2x16x128xf32>
    %cst_40 = arith.constant 2.000000e-01 : f32
    %135 = vector.broadcast %cst_40 : f32 to vector<2x16x128xf32>
    %136 = arith.mulf %135, %132 : vector<2x16x128xf32>
    %137 = arith.select %134, %132, %136 : vector<2x16x128xi1>, vector<2x16x128xf32>
    %138 = arith.addf %137, %51 : vector<2x16x128xf32>
    %c0_41 = arith.constant 0 : index
    %c0_42 = arith.constant 0 : index
    %c0_43 = arith.constant 0 : index
    %139 = vector.load %arg12[%c0_41, %c0_42, %c0_43] : memref<2x16x128xf32, #tpu.memory_space<vmem>>, vector<2x16x128xf32>
    tpu.vector_store %arg12[%c0_41, %c0_42, %c0_43], %138 {strides = array<i32>} : memref<2x16x128xf32, #tpu.memory_space<vmem>>, vector<2x16x128xf32>,
    return
  }
  func.func @transform_0(%arg0: i32) -> (i32, i32) {
    %c0_i32 = arith.constant 0 : i32
    %c0_i32_0 = arith.constant 0 : i32
    return %arg0, %c0_i32 : i32, i32
  }
  func.func @transform_1(%arg0: i32) -> (i32, i32, i32) {
    %c0_i32 = arith.constant 0 : i32
    %c0_i32_0 = arith.constant 0 : i32
    %c0_i32_1 = arith.constant 0 : i32
    return %arg0, %c0_i32, %c0_i32_0 : i32, i32, i32
  }
  func.func @transform_2(%arg0: i32) -> (i32, i32) {
    %c0_i32 = arith.constant 0 : i32
    %c0_i32_0 = arith.constant 0 : i32
    %c0_i32_1 = arith.constant 0 : i32
    return %c0_i32, %c0_i32_0 : i32, i32
  }
  func.func @transform_3(%arg0: i32) -> (i32, i32) {
    %c0_i32 = arith.constant 0 : i32
    %c0_i32_0 = arith.constant 0 : i32
    %c0_i32_1 = arith.constant 0 : i32
    return %c0_i32, %c0_i32_0 : i32, i32
  }
  func.func @transform_4(%arg0: i32) -> (i32, i32) {
    %c0_i32 = arith.constant 0 : i32
    %c0_i32_0 = arith.constant 0 : i32
    %c0_i32_1 = arith.constant 0 : i32
    return %c0_i32, %c0_i32_0 : i32, i32
  }
  func.func @transform_5(%arg0: i32) -> (i32, i32) {
    %c0_i32 = arith.constant 0 : i32
    %c0_i32_0 = arith.constant 0 : i32
    %c0_i32_1 = arith.constant 0 : i32
    return %c0_i32, %c0_i32_0 : i32, i32
  }
  func.func @transform_6(%arg0: i32) -> (i32, i32) {
    %c0_i32 = arith.constant 0 : i32
    %c0_i32_0 = arith.constant 0 : i32
    %c0_i32_1 = arith.constant 0 : i32
    return %c0_i32, %c0_i32_0 : i32, i32
  }
  func.func @transform_7(%arg0: i32) -> (i32, i32) {
    %c0_i32 = arith.constant 0 : i32
    %c0_i32_0 = arith.constant 0 : i32
    %c0_i32_1 = arith.constant 0 : i32
    return %c0_i32, %c0_i32_0 : i32, i32
  }
  func.func @transform_8(%arg0: i32) -> (i32, i32) {
    %c0_i32 = arith.constant 0 : i32
    %c0_i32_0 = arith.constant 0 : i32
    %c0_i32_1 = arith.constant 0 : i32
    return %c0_i32, %c0_i32_0 : i32, i32
  }
  func.func @transform_9(%arg0: i32) -> (i32, i32) {
    %c0_i32 = arith.constant 0 : i32
    %c0_i32_0 = arith.constant 0 : i32
    %c0_i32_1 = arith.constant 0 : i32
    return %c0_i32, %c0_i32_0 : i32, i32
  }
  func.func @transform_10(%arg0: i32) -> (i32, i32) {
    %c0_i32 = arith.constant 0 : i32
    %c0_i32_0 = arith.constant 0 : i32
    %c0_i32_1 = arith.constant 0 : i32
    return %c0_i32, %c0_i32_0 : i32, i32
  }
  func.func @transform_11(%arg0: i32) -> (i32, i32, i32) {
    %c0_i32 = arith.constant 0 : i32
    %c0_i32_0 = arith.constant 0 : i32
    %c0_i32_1 = arith.constant 0 : i32
    return %arg0, %c0_i32, %c0_i32_0 : i32, i32, i32
  }
}

</mosaic_0001>

<bundles_post_ra>
// kernel: tpu_custom_call.1
= control target key start
LH: loop header
LB: loop body
LE: loop exit
PB: predicated region body
PF: predicated region fallthrough
CT: control target
= control target key end

     0   :  { %16 = vsyncpa [#allocation3], 0  ;;  %s5019_s0 = inlined_call_operand.hbm [shape: f32[2,32], index: 0, kind: input, shape index: {}]   ;;  %s5020_s1 = inlined_call_operand.hbm [shape: f32[2,16,128], index: 1, kind: input, shape index: {}]   ;;  %s5021_s2 = inlined_call_operand.hbm [shape: f32[32,256], index: 2, kind: input, shape index: {}]   ;;  %s5022_s3 = inlined_call_operand.vmem [shape: f32[1,256], index: 3, kind: input, shape index: {}]   ;;  %s5023_s4 = inlined_call_operand.hbm [shape: f32[1152,128], index: 4, kind: input, shape index: {}]   ;;  %s5024_s5 = inlined_call_operand.hbm [shape: f32[128,128], index: 5, kind: input, shape index: {}]   ;;  %s5025_s6 = inlined_call_operand.vmem [shape: f32[1,128], index: 6, kind: input, shape index: {}]   ;;  %s5026_s7 = inlined_call_operand.hbm [shape: f32[1152,128], index: 7, kind: input, shape index: {}]   ;;  %s5027_s8 = inlined_call_operand.hbm [shape: f32[128,128], index: 8, kind: input, shape index: {}]   ;;  %s5028_s9 = inlined_call_operand.vmem [shape: f32[1,128], index: 9, kind: input, shape index: {}]   ;;  %s5029_s10 = inlined_call_operand.hbm [shape: f32[128,128], index: 10, kind: input, shape index: {}]   ;;  %s5030_s11 = inlined_call_operand.hbm [shape: f32[2,16,128], index: 11, kind: output, shape index: {}]  }
   0x1   :  { %17 = vsyncpa [#allocation6], 0 }
   0x2   :  { %18 = vsyncpa [#allocation9], 0 }
   0x3   :  { %19 = vsyncpa [#allocation12], 0 }
   0x4   :  { %20 = vsyncpa [#allocation15], 0 }
   0x5   :  { %21 = vsyncpa [#allocation4], 0  ;;  %s3696_s17 = smov [#allocation5]   ;;  %s3486_s21 = scalar_lea.hbm %s5020_s1, 512 }
   0x6   :  { %s37_s18 = sshll.u32 %s3696_s17, 4  ;;  %p3487_p0 = scmp.ne.s32.totalorder %s5020_s1, %s3486_s21  ;;  %s38_s18 = int_to_ptr.vmem [resolvable:$true] %s37_s18 }
   0x7   :  { %p3490_p1 = scmp.lt.u32.totalorder %s3486_s21, %s5020_s1 }
   0x9   :  { %p3492_p2 = pnand %p3490_p1, %p3487_p0 }
   0xb   :  { %3495 = shalt.err (!%p3492_p2)
}
   0xc   :  { %s3496_s26 = scalar_lea.vmem %s38_s18, 512  ;;  %p3501_p4 = scmp.lt.s32.totalorder %s38_s18, %s38_s18 }
   0xd   :  { %p3497_p3 = scmp.ne.s32.totalorder %s38_s18, %s3496_s26  ;;  %p3502_p5 = scmp.lt.s32.totalorder %s3496_s26, %s3496_s26 }
   0xf   :  { %p3503_p6 = por %p3502_p5, %p3501_p4 }
  0x11   :  { %p3504_p7 = pnand %p3503_p6, %p3497_p3 }
  0x13   :  { %3507 = shalt.err (!%p3504_p7)
}
  0x14   :  { %s3697_s27 = smov 128   ;;  %s3698_s28 = smov 8  }
  0x15   :  { %43 = dma.hbm_to_vmem [thread:$0]  %s5020_s1, 512, %s38_s18, [#allocation6], %s3697_s27, %s3697_s27, %s3698_s28  }
  0x16   :  { %s3699_s12 = smov [#allocation8]   ;;  %s3700_s14 = smov [#allocation11]  }
  0x17   :  { %s63_s13 = sshll.u32 %s3699_s12, 4  ;;  %s89_s15 = sshll.u32 %s3700_s14, 4  ;;  %s64_s13 = int_to_ptr.vmem [resolvable:$true] %s63_s13  ;;  %s90_s15 = int_to_ptr.vmem [resolvable:$true] %s89_s15 }
  0x18   :  { %s3508_s19 = scalar_lea.hbm %s5023_s4, 18432 }
  0x19   :  { %p3509_p8 = scmp.ne.s32.totalorder %s5023_s4, %s3508_s19  ;;  %p3512_p9 = scmp.lt.u32.totalorder %s3508_s19, %s5023_s4 }
  0x1b   :  { %p3514_p10 = pnand %p3512_p9, %p3509_p8 }
  0x1d   :  { %3517 = shalt.err (!%p3514_p10)
}
  0x1e   :  { %s3518_s1 = scalar_lea.vmem %s64_s13, 18432  ;;  %p3523_p12 = scmp.lt.s32.totalorder %s64_s13, %s64_s13 }
  0x1f   :  { %p3519_p11 = scmp.ne.s32.totalorder %s64_s13, %s3518_s1  ;;  %p3524_p13 = scmp.lt.s32.totalorder %s3518_s1, %s3518_s1 }
  0x21   :  { %p3525_p0 = por %p3524_p13, %p3523_p12 }
  0x23   :  { %p3526_p1 = pnand %p3525_p0, %p3519_p11 }
  0x25   :  { %3529 = shalt.err (!%p3526_p1)
}
  0x26   :  { %69 = dma.hbm_to_vmem [thread:$0]  %s5023_s4, 18432, %s64_s13, [#allocation9], %s3697_s27, %s3697_s27, %s3698_s28  }
  0x27   :  { %s3530_s29 = scalar_lea.hbm %s5026_s7, 18432 }
  0x28   :  { %p3531_p2 = scmp.ne.s32.totalorder %s5026_s7, %s3530_s29  ;;  %p3534_p3 = scmp.lt.u32.totalorder %s3530_s29, %s5026_s7 }
  0x2a   :  { %p3536_p4 = pnand %p3534_p3, %p3531_p2 }
  0x2c   :  { %3539 = shalt.err (!%p3536_p4)
}
  0x2d   :  { %s3540_s17 = scalar_lea.vmem %s90_s15, 18432  ;;  %p3545_p6 = scmp.lt.s32.totalorder %s90_s15, %s90_s15 }
  0x2e   :  { %p3541_p5 = scmp.ne.s32.totalorder %s90_s15, %s3540_s17  ;;  %p3546_p7 = scmp.lt.s32.totalorder %s3540_s17, %s3540_s17 }
  0x30   :  { %p3547_p8 = por %p3546_p7, %p3545_p6 }
  0x32   :  { %p3548_p9 = pnand %p3547_p8, %p3541_p5 }
  0x34   :  { %3551 = shalt.err (!%p3548_p9)
}
  0x35   :  { %95 = dma.hbm_to_vmem [thread:$0]  %s5026_s7, 18432, %s90_s15, [#allocation12], %s3697_s27, %s3697_s27, %s3698_s28  }
  0x36   :  { %s3701_s19 = smov [#allocation2]   ;;  %s3702_s21 = smov [#allocation7]  }
  0x37   :  { %s28_s20 = sshll.u32 %s3701_s19, 4  ;;  %s49_s22 = sshll.u32 %s3702_s21, 4  ;;  %s29_s20 = int_to_ptr.vmem [resolvable:$true] %s28_s20  ;;  %s50_s22 = int_to_ptr.vmem [resolvable:$true] %s49_s22 }
  0x38   :  { %s3552_s18 = scalar_lea.hbm %s5019_s0, 32 }
  0x39   :  { %p3553_p10 = scmp.ne.s32.totalorder %s5019_s0, %s3552_s18  ;;  %p3556_p11 = scmp.lt.u32.totalorder %s3552_s18, %s5019_s0 }
  0x3b   :  { %p3558_p12 = pnand %p3556_p11, %p3553_p10 }
  0x3d   :  { %3561 = shalt.err (!%p3558_p12)
}
  0x3e   :  { %s3562_s7 = scalar_lea.vmem %s29_s20, 32  ;;  %p3567_p0 = scmp.lt.s32.totalorder %s29_s20, %s29_s20 }
  0x3f   :  { %p3563_p13 = scmp.ne.s32.totalorder %s29_s20, %s3562_s7  ;;  %p3568_p1 = scmp.lt.s32.totalorder %s3562_s7, %s3562_s7 }
  0x41   :  { %p3569_p2 = por %p3568_p1, %p3567_p0 }
  0x43   :  { %p3570_p3 = pnand %p3569_p2, %p3563_p13 }
  0x45   :  { %3573 = shalt.err (!%p3570_p3)
}
  0x46   :  { %31 = dma.hbm_to_vmem [thread:$0]  %s5019_s0, 32, %s29_s20, [#allocation3]  }
  0x47   :  { %s3574_s16 = scalar_lea.hbm %s5021_s2, 1024 }
  0x48   :  { %p3575_p4 = scmp.ne.s32.totalorder %s5021_s2, %s3574_s16  ;;  %p3578_p5 = scmp.lt.u32.totalorder %s3574_s16, %s5021_s2 }
  0x4a   :  { %p3580_p6 = pnand %p3578_p5, %p3575_p4 }
  0x4c   :  { %3583 = shalt.err (!%p3580_p6)
}
  0x4d   :  { %s3584_s21 = scalar_lea.vmem %s50_s22, 1024  ;;  %p3589_p8 = scmp.lt.s32.totalorder %s50_s22, %s50_s22 }
  0x4e   :  { %p3585_p7 = scmp.ne.s32.totalorder %s50_s22, %s3584_s21  ;;  %p3590_p9 = scmp.lt.s32.totalorder %s3584_s21, %s3584_s21 }
  0x50   :  { %p3591_p10 = por %p3590_p9, %p3589_p8 }
  0x52   :  { %p3592_p11 = pnand %p3591_p10, %p3585_p7 }
  0x54   :  { %3595 = shalt.err (!%p3592_p11)
}
  0x55   :  { %s3703_s0 = smov 256   ;;  %s3704_s20 = smov 16  }
  0x56   :  { %55 = dma.hbm_to_vmem [thread:$0]  %s5021_s2, 1024, %s50_s22, [#allocation6], %s3703_s0, %s3703_s0, %s3704_s20  }
  0x57   :  { %s3705_s18 = smov [#allocation10]   ;;  %s3706_s25 = smov [#allocation13]  }
  0x58   :  { %s75_s24 = sshll.u32 %s3705_s18, 4  ;;  %s101_s26 = sshll.u32 %s3706_s25, 4  ;;  %s76_s24 = int_to_ptr.vmem [resolvable:$true] %s75_s24  ;;  %s102_s26 = int_to_ptr.vmem [resolvable:$true] %s101_s26 }
  0x59   :  { %s3596_s15 = scalar_lea.hbm %s5024_s5, 2048 }
  0x5a   :  { %p3597_p12 = scmp.ne.s32.totalorder %s5024_s5, %s3596_s15  ;;  %p3600_p13 = scmp.lt.u32.totalorder %s3596_s15, %s5024_s5 }
  0x5c   :  { %p3602_p0 = pnand %p3600_p13, %p3597_p12 }
  0x5e   :  { %3605 = shalt.err (!%p3602_p0)
}
  0x5f   :  { %s3606_s2 = scalar_lea.vmem %s76_s24, 2048  ;;  %p3611_p2 = scmp.lt.s32.totalorder %s76_s24, %s76_s24 }
  0x60   :  { %p3607_p1 = scmp.ne.s32.totalorder %s76_s24, %s3606_s2  ;;  %p3612_p3 = scmp.lt.s32.totalorder %s3606_s2, %s3606_s2 }
  0x62   :  { %p3613_p4 = por %p3612_p3, %p3611_p2 }
  0x64   :  { %p3614_p5 = pnand %p3613_p4, %p3607_p1 }
  0x66   :  { %3617 = shalt.err (!%p3614_p5)
}
  0x67   :  { %81 = dma.hbm_to_vmem [thread:$0]  %s5024_s5, 2048, %s76_s24, [#allocation9], %s3697_s27, %s3697_s27, %s3698_s28  }
  0x68   :  { %s3618_s19 = scalar_lea.hbm %s5027_s8, 2048 }
  0x69   :  { %p3619_p6 = scmp.ne.s32.totalorder %s5027_s8, %s3618_s19  ;;  %p3622_p7 = scmp.lt.u32.totalorder %s3618_s19, %s5027_s8 }
  0x6b   :  { %p3624_p8 = pnand %p3622_p7, %p3619_p6 }
  0x6d   :  { %3627 = shalt.err (!%p3624_p8)
}
  0x6e   :  { %s3628_s1 = scalar_lea.vmem %s102_s26, 2048  ;;  %p3633_p10 = scmp.lt.s32.totalorder %s102_s26, %s102_s26 }
  0x6f   :  { %p3629_p9 = scmp.ne.s32.totalorder %s102_s26, %s3628_s1  ;;  %p3634_p11 = scmp.lt.s32.totalorder %s3628_s1, %s3628_s1 }
  0x71   :  { %p3635_p12 = por %p3634_p11, %p3633_p10 }
  0x73   :  { %p3636_p13 = pnand %p3635_p12, %p3629_p9 }
  0x75   :  { %3639 = shalt.err (!%p3636_p13)
}
  0x76   :  { %107 = dma.hbm_to_vmem [thread:$0]  %s5027_s8, 2048, %s102_s26, [#allocation12], %s3697_s27, %s3697_s27, %s3698_s28  }
  0x77   :  { %s3707_s24 = smov [#allocation14]   ;;  %s3640_s15 = scalar_lea.hbm %s5029_s10, 2048 }
  0x78   :  { %s115_s25 = sshll.u32 %s3707_s24, 4  ;;  %p3641_p0 = scmp.ne.s32.totalorder %s5029_s10, %s3640_s15  ;;  %s116_s25 = int_to_ptr.vmem [resolvable:$true] %s115_s25 }
  0x79   :  { %p3644_p1 = scmp.lt.u32.totalorder %s3640_s15, %s5029_s10 }
  0x7b   :  { %p3646_p2 = pnand %p3644_p1, %p3641_p0 }
  0x7d   :  { %3649 = shalt.err (!%p3646_p2)
}
  0x7e   :  { %s3650_s2 = scalar_lea.vmem %s116_s25, 2048  ;;  %p3655_p4 = scmp.lt.s32.totalorder %s116_s25, %s116_s25 }
  0x7f   :  { %p3651_p3 = scmp.ne.s32.totalorder %s116_s25, %s3650_s2  ;;  %p3656_p5 = scmp.lt.s32.totalorder %s3650_s2, %s3650_s2 }
  0x81   :  { %p3657_p6 = por %p3656_p5, %p3655_p4 }
  0x83   :  { %p3658_p7 = pnand %p3657_p6, %p3651_p3 }
  0x85   :  { %3661 = shalt.err (!%p3658_p7)
}
  0x86   :  { %121 = dma.hbm_to_vmem [thread:$0]  %s5029_s10, 2048, %s116_s25, [#allocation15], %s3697_s27, %s3697_s27, %s3698_s28  }
  0x87   :  { %3684 = dma.done.wait [#allocation3], 32  }
  0x88   :  { %3685 = vsyncadd [#allocation3], 4294967264 }
  0x89   :  { %3686 = dma.done.wait [#allocation6], 1536  }
  0x8a   :  { %3687 = vsyncadd [#allocation6], 4294965760 }
  0x8b   :  { %3688 = dma.done.wait [#allocation9], 20480  }
  0x8c   :  { %3689 = vsyncadd [#allocation9], 4294946816 }
  0x8d   :  { %3690 = dma.done.wait [#allocation12], 20480  }
  0x8e   :  { %3691 = vsyncadd [#allocation12], 4294946816 }
  0x8f   :  { %3692 = dma.done.wait [#allocation15], 2048  }
  0x90   :  { %3693 = vsyncadd [#allocation15], 4294965248  ;;  %v3708_v0 = vmov 0.0   ;;  %v3709_v1 = vmov 0.0|0.0   ;;  %v191_v2 = vld [vmem:[#allocation7 + $0x8] sm:$0xff]  ;;  %v193_v3 = vld [vmem:[#allocation7 + $0x18] sm:$0xff] }
  0x91   :  { %278 = vmatprep.mubr.f32.mxu0 %v3708_v0  ;;  %3065 = vmatprep.subr.bf16.mxu1 %v3709_v1  ;;  %v190_v4 = vld [vmem:[#allocation7] sm:$0xff]  ;;  %v3057_v5 = vpack.c.bf16 %v193_v3, %v191_v2  ;;  %v192_v6 = vld [vmem:[#allocation7 + $0x10] sm:$0xff]  ;;  %v195_v7 = vld [vmem:[#allocation7 + $0x28] sm:$0xff]  ;;  %vm210_vm0 = vcmask 261120   ;;  %vm3710_vm1 = vmmov 0   ;;  %vm775_vm4 = vcmask 1046528  }
  0x92   :  { %v197_v8 = vld [vmem:[#allocation7 + $0x38] sm:$0xff]  ;;  %v3059_v9 = vpack.c.bf16 %v192_v6, %v190_v4  ;;  %v194_v11 = vld [vmem:[#allocation7 + $0x20] sm:$0xff]  ;;  %v196_v12 = vld [vmem:[#allocation7 + $0x30] sm:$0xff]  ;;  %2905 = vmatprep.mubr.msk.f32.mxu1 %vm3710_vm1, %v3708_v0  ;;  %vm763_vm5 = vcmask 1044480   ;;  %vm749_vm8 = vcmask 1042432   ;;  %vm787_vm9 = vcmask 1040384  }
  0x93   :  { %v3061_v10 = vpack.c.bf16 %v197_v8, %v195_v7  ;;  %3058 = vmatprep.subr.bf16.mxu0 %v3057_v5  ;;  %v286_v13 = vld [vmem:[#allocation10] sm:$0xff]  ;;  %v287_v14 = vld [vmem:[#allocation10 + $0x8] sm:$0xff]  ;;  %v3063_v15 = vpack.c.bf16 %v196_v12, %v194_v11  ;;  %v288_v17 = vld [vmem:[#allocation10 + $0x10] sm:$0xff]  ;;  %v3711_v8 = vmov 1966171168   ;;  %vm843_vm10 = vcmask 1043456  }
  0x94   :  { %3060 = vmatpush1.bf16.msra.mxu0 %v3059_v9  ;;  %v3066_v16 = vpack.c.bf16 %v287_v14, %v286_v13  ;;  %v289_v18 = vld [vmem:[#allocation10 + $0x18] sm:$0xff]  ;;  %v374_v19 = vld [vmem:[#allocation13] sm:$0xff]  ;;  %v375_v20 = vld [vmem:[#allocation13 + $0x8] sm:$0xff]  ;;  %v568_v9 = vunpack.c.l.s4 %v3711_v8  ;;  %vm864_vm11 = vcmask 1041408   ;;  %vm828_vm12 = vcmask 1045504  }
  0x95   :  { %3062 = vmatprep.subr.bf16.mxu0 %v3061_v10  ;;  %v3069_v21 = vpack.c.bf16 %v289_v18, %v288_v17  ;;  %v290_v22 = vld [vmem:[#allocation10 + $0x20] sm:$0xff]  ;;  %v291_v23 = vld [vmem:[#allocation10 + $0x28] sm:$0xff]  ;;  %v150_v24 = vld [vmem:[#allocation2] sm:$0x3]  ;;  %v3090_v25 = vpack.c.bf16 %v375_v20, %v374_v19 }
  0x96   :  { %3067 = vmatpush3.bf16.msra.mxu1 %v3066_v16  ;;  %v376_v26 = vld [vmem:[#allocation13 + $0x10] sm:$0xff]  ;;  %v377_v27 = vld [vmem:[#allocation13 + $0x18] sm:$0xff]  ;;  %v3072_v28 = vpack.c.bf16 %v291_v23, %v290_v22  ;;  %v378_v32 = vld [vmem:[#allocation13 + $0x20] sm:$0xff]  ;;  %v569_v13 = vunpack.c.0.s8 %v568_v9 }
  0x97   :  { %3068 = vmatprep.subr.bf16.mxu1 %v3709_v1  ;;  %v292_v29 = vld [vmem:[#allocation10 + $0x30] sm:$0xff]  ;;  %v293_v30 = vld [vmem:[#allocation10 + $0x38] sm:$0xff]  ;;  %v3093_v31 = vpack.c.bf16 %v377_v27, %v376_v26  ;;  %v379_v33 = vld [vmem:[#allocation13 + $0x28] sm:$0xff] }
  0x98   :  { %3064 = vmatpush1.bf16.msra.mxu0 %v3063_v15  ;;  %v3075_v34 = vpack.c.bf16 %v293_v30, %v292_v29  ;;  %v294_v35 = vld [vmem:[#allocation10 + $0x40] sm:$0xff]  ;;  %v295_v36 = vld [vmem:[#allocation10 + $0x48] sm:$0xff]  ;;  %v3096_v37 = vpack.c.bf16 %v379_v33, %v378_v32  ;;  %v380_v38 = vld [vmem:[#allocation13 + $0x30] sm:$0xff] }
  0x99   :  { %3089 = vmatprep.subr.bf16.mxu0 %v3709_v1  ;;  %v381_v39 = vld [vmem:[#allocation13 + $0x38] sm:$0xff]  ;;  %v3078_v40 = vpack.c.bf16 %v295_v36, %v294_v35  ;;  %v296_v41 = vld [vmem:[#allocation10 + $0x50] sm:$0xff]  ;;  %v382_v44 = vld [vmem:[#allocation13 + $0x40] sm:$0xff] }
  0x9a   :  { %3070 = vmatpush3.bf16.msra.mxu1 %v3069_v21  ;;  %v297_v42 = vld [vmem:[#allocation10 + $0x58] sm:$0xff]  ;;  %v3099_v43 = vpack.c.bf16 %v381_v39, %v380_v38  ;;  %v383_v45 = vld [vmem:[#allocation13 + $0x48] sm:$0xff]  ;;  %v298_v47 = vld [vmem:[#allocation10 + $0x60] sm:$0xff] }
  0x9b   :  { %2424 = vmatmul.mubr.msk.f32.vlgmr.msra.gmra.mrb[0].mxu0 %vm210_vm0, %v150_v24  ;;  %3071 = vmatprep.subr.bf16.mxu1 %v3709_v1  ;;  %v3081_v46 = vpack.c.bf16 %v297_v42, %v296_v41  ;;  %v299_v48 = vld [vmem:[#allocation10 + $0x68] sm:$0xff]  ;;  %v3102_v49 = vpack.c.bf16 %v383_v45, %v382_v44  ;;  %v384_v50 = vld [vmem:[#allocation13 + $0x50] sm:$0xff]  ;;  %v385_v51 = vld [vmem:[#allocation13 + $0x58] sm:$0xff] }
  0x9c   :  { %3091 = vmatpush3.bf16.msra.mxu0 %v3090_v25  ;;  %v3084_v52 = vpack.c.bf16 %v299_v48, %v298_v47  ;;  %v3105_v53 = vpack.c.bf16 %v385_v51, %v384_v50  ;;  %v386_v54 = vld [vmem:[#allocation13 + $0x60] sm:$0xff]  ;;  %v387_v55 = vld [vmem:[#allocation13 + $0x68] sm:$0xff]  ;;  %v300_v57 = vld [vmem:[#allocation10 + $0x70] sm:$0xff]  ;;  %2940 = vmatprep.mubr.msk.f32.mxu0 %vm3710_vm1, %v3708_v0 }
  0x9d   :  { %3092 = vmatprep.subr.bf16.mxu0 %v3709_v1  ;;  %v3108_v56 = vpack.c.bf16 %v387_v55, %v386_v54  ;;  %v301_v58 = vld [vmem:[#allocation10 + $0x78] sm:$0xff]  ;;  %v388_v60 = vld [vmem:[#allocation13 + $0x70] sm:$0xff]  ;;  %v461_v63 = vld [vmem:[#allocation14] sm:$0xff] }
  0x9e   :  { %3073 = vmatpush3.bf16.msra.mxu1 %v3072_v28  ;;  %v3087_v59 = vpack.c.bf16 %v301_v58, %v300_v57  ;;  %v389_v61 = vld [vmem:[#allocation13 + $0x78] sm:$0xff]  ;;  %v462_v2 = vld [vmem:[#allocation14 + $0x8] sm:$0xff]  ;;  %v619_v4 = vld [vmem:[#allocation8 + $0x80] sm:$0xff] }
  0x9f   :  { %3074 = vmatprep.subr.bf16.mxu1 %v3709_v1  ;;  %v3111_v62 = vpack.c.bf16 %v389_v61, %v388_v60  ;;  %v3113_v3 = vpack.c.bf16 %v462_v2, %v461_v63  ;;  %v620_v5 = vld [vmem:[#allocation8 + $0x88] sm:$0xff]  ;;  %v198_v11 = vld [vmem:[%s5022_s3] sm:$0x3]  ;;  %v603_v17 = vld [vmem:[#allocation8] sm:$0xff] }
  0xa0   :  { %3094 = vmatpush3.bf16.msra.mxu0 %v3093_v31  ;;  %v3145_v6 = vpack.c.bf16 %v620_v5, %v619_v4  ;;  %v604_v19 = vld [vmem:[#allocation8 + $0x8] sm:$0xff]  ;;  %v463_v20 = vld [vmem:[#allocation14 + $0x10] sm:$0xff]  ;;  %v464_v21 = vld [vmem:[#allocation14 + $0x18] sm:$0xff] }
  0xa1   :  { %3095 = vmatprep.subr.bf16.mxu0 %v3709_v1  ;;  %v621_v24 = vld [vmem:[#allocation8 + $0x90] sm:$0xff]  ;;  %v622_v25 = vld [vmem:[#allocation8 + $0x98] sm:$0xff]  ;;  %v3147_v30 = vpack.c.bf16 %v604_v19, %v603_v17  ;;  %v3117_v31 = vpack.c.bf16 %v464_v21, %v463_v20  ;;  %v465_v36 = vld [vmem:[#allocation14 + $0x20] sm:$0xff] }
  0xa2   :  { %3076 = vmatpush3.bf16.msra.mxu1 %v3075_v34  ;;  %v605_v32 = vld [vmem:[#allocation8 + $0x10] sm:$0xff]  ;;  %v3149_v34 = vpack.c.bf16 %v622_v25, %v621_v24  ;;  %v606_v35 = vld [vmem:[#allocation8 + $0x18] sm:$0xff]  ;;  %v623_v39 = vld [vmem:[#allocation8 + $0xa0] sm:$0xff] }
  0xa3   :  { %3077 = vmatprep.subr.bf16.mxu1 %v3709_v1  ;;  %v146_v41 = vld [vmem:[#allocation5] sm:$0xff]  ;;  %v3931_v42 = vld [vmem:[#allocation5 + $0x8] sm:$0xff]  ;;  %v467_v51 = vld [vmem:[#allocation14 + $0x30] sm:$0xff] }
  0xa4   :  { %3097 = vmatpush3.bf16.msra.mxu0 %v3096_v37  ;;  %v466_v37 = vld [vmem:[#allocation14 + $0x28] sm:$0xff]  ;;  %v607_v48 = vld [vmem:[#allocation8 + $0x20] sm:$0xff]  ;;  %v626_v57 = vld [vmem:[#allocation8 + $0xb8] sm:$0xff] }
  0xa5   :  { %3098 = vmatprep.subr.bf16.mxu0 %v3709_v1  ;;  %v3121_v47 = vpack.c.bf16 %v466_v37, %v465_v36  ;;  %v608_v50 = vld [vmem:[#allocation8 + $0x28] sm:$0xff]  ;;  %v609_v2 = vld [vmem:[#allocation8 + $0x30] sm:$0xff]  ;;  %v610_v4 = vld [vmem:[#allocation8 + $0x38] sm:$0xff] }
  0xa6   :  { %3079 = vmatpush3.bf16.msra.mxu1 %v3078_v40  ;;  %v624_v40 = vld [vmem:[#allocation8 + $0xa8] sm:$0xff]  ;;  %v3155_v60 = vpack.c.bf16 %v608_v50, %v607_v48  ;;  %v469_v5 = vld [vmem:[#allocation14 + $0x40] sm:$0xff]  ;;  %v3159_v17 = vpack.c.bf16 %v610_v4, %v609_v2  ;;  %v472_v24 = vld [vmem:[#allocation14 + $0x58] sm:$0xff] }
  0xa7   :  { %3080 = vmatprep.subr.bf16.mxu1 %v3709_v1  ;;  %v627_v8 = vld [vmem:[#allocation8 + $0xc0] sm:$0xff]  ;;  %v628_v9 = vld [vmem:[#allocation8 + $0xc8] sm:$0xff]  ;;  %v629_v25 = vld [vmem:[#allocation8 + $0xd0] sm:$0xff] }
  0xa8   :  { %3100 = vmatpush3.bf16.msra.mxu0 %v3099_v43  ;;  %v611_v19 = vld [vmem:[#allocation8 + $0x40] sm:$0xff]  ;;  %v3161_v21 = vpack.c.bf16 %v628_v9, %v627_v8  ;;  %v3992_v48 = vld [vmem:[#allocation8 + $0x68] sm:$0xff]  ;;  %v4006_v4 = vld [vmem:[#allocation8 + $0x78] sm:$0xff] }
  0xa9   :  { %3101 = vmatprep.subr.bf16.mxu0 %v3709_v1 }
  0xaa   :  { %3082 = vmatpush3.bf16.msra.mxu1 %v3081_v46  ;;  %v3151_v46 = vpack.c.bf16 %v606_v35, %v605_v32 }
  0xab   :  { %3083 = vmatprep.subr.bf16.mxu1 %v3709_v1 }
  0xac   :  { %3103 = vmatpush3.bf16.msra.mxu0 %v3102_v49  ;;  %v3153_v49 = vpack.c.bf16 %v624_v40, %v623_v39  ;;  %v473_v39 = vld [vmem:[#allocation14 + $0x60] sm:$0xff]  ;;  %v474_v40 = vld [vmem:[#allocation14 + $0x68] sm:$0xff] }
  0xad   :  { %3104 = vmatprep.subr.bf16.mxu0 %v3709_v1 }
  0xae   :  { %3085 = vmatpush3.bf16.msra.mxu1 %v3084_v52  ;;  %v468_v52 = vld [vmem:[#allocation14 + $0x38] sm:$0xff] }
  0xaf   :  { %3086 = vmatprep.subr.bf16.mxu1 %v3709_v1  ;;  %v3125_v61 = vpack.c.bf16 %v468_v52, %v467_v51  ;;  %v3995_v51 = vld [vmem:[#allocation5 + $0x18] sm:$0xff] }
  0xb0   :  { %3106 = vmatpush3.bf16.msra.mxu0 %v3105_v53  ;;  %v3937_v53 = vrot.slane %v3708_v0, 1 }
  0xb1   :  { %3107 = vmatprep.subr.bf16.mxu0 %v3709_v1 }
  0xb2   :  { %3088 = vmatpush3.bf16.msra.mxu1 %v3087_v59  ;;  %v3137_v59 = vpack.c.bf16 %v474_v40, %v473_v39 }
  0xb3   :  { %3114 = vmatprep.subr.bf16.mxu1 %v3113_v3 }
  0xb4   :  { %3109 = vmatpush3.bf16.msra.mxu0 %v3108_v56  ;;  %v625_v56 = vld [vmem:[#allocation8 + $0xb0] sm:$0xff] }
  0xb5   :  { %3110 = vmatprep.subr.bf16.mxu0 %v3709_v1  ;;  %v151_v1 = vlaneseq }
  0xb7   :  { %v3906_v7 = vshrl.u32 %v151_v1, 7 }
  0xb8   :  { %3112 = vmatpush3.bf16.msra.mxu0 %v3111_v62 }
  0xb9   :  { %3146 = vmatprep.subr.bf16.mxu0 %v3145_v6  ;;  %v3909_v10 = vsub.s32 0, %v3906_v7  ;;  %v206_v12 = vsub.s32 1, %v3906_v7  ;;  %v3917_v16 = vsub.s32 %v569_v13, %v3906_v7  ;;  %v3922_v27 = vadd.s32 8, %v3906_v7  ;;  %v470_v6 = vld [vmem:[#allocation14 + $0x48] sm:$0xff] }
  0xba   :  { %v158_v43 = vand.u32 3, %v3906_v7 }
  0xbb   :  { %5093 = vst [vmem:[#allocation23_spill] sm:$0xff] %v3909_v10  ;;  %v203_v14 = vrot.slane %v198_v11, %v3909_v10  ;;  %v207_v15 = vrot.slane %v198_v11, %v206_v12  ;;  %5094 = vst [vmem:[#allocation24_spill] sm:$0xff] %v3917_v16  ;;  %v165_v44 = vand.u32 3, %v3922_v27  ;;  %v630_v27 = vld [vmem:[#allocation8 + $0xd8] sm:$0xff] }
  0xbc   :  { %vm3944_vm2 = vcmp.ge.s32.totalorder %v158_v43, 1  ;;  %vm184_vm6 = vcmp.le.s32.totalorder %v158_v43, 2  ;;  %v3165_v37 = vpack.c.bf16 %v630_v27, %v629_v25  ;;  %v632_v43 = vld [vmem:[#allocation8 + $0xe8] sm:$0xff] }
  0xbd   :  { %vm3948_vm3 = vcmp.ge.s32.totalorder %v165_v44, 1  ;;  %v2420_v11 = vsel %vm3944_vm2, 1.0, %v3708_v0  ;;  %vm185_vm7 = vcmp.le.s32.totalorder %v165_v44, 2  ;;  %v2422_v35 = vsel %vm184_vm6, 1.0, %v3708_v0 }
  0xbe   :  { %v3979_v36 = vsel %vm185_vm7, 1.0, %v3708_v0 }
 0x16e   :  { %v280_v18 = vpop.f32.mrb[0].mxu0 }
 0x16f   :  { %v281_v22 = vadd.f32 %v280_v18, %v203_v14  ;;  %v282_v23 = vpop.f32.mrb[1].mxu0  ;;  %v3129_v18 = vpack.c.bf16 %v470_v6, %v469_v5  ;;  %v4008_v5 = vld [vmem:[#allocation8 + $0x180] sm:$0xff]  ;;  %v4010_v6 = vld [vmem:[#allocation8 + $0x188] sm:$0xff] }
 0x170   :  { %v3919_v26 = vadd.f32 %v282_v23, %v207_v15  ;;  %v2421_v15 = vsel %vm3948_vm3, 1.0, %v3708_v0  ;;  %v471_v23 = vld [vmem:[#allocation14 + $0x50] sm:$0xff]  ;;  %v3990_v0 = vld [vmem:[#allocation8 + $0x60] sm:$0xff] }
 0x171   :  { %v285_v28 = vmul.f32 %v281_v22, %v281_v22  ;;  %v3925_v29 = vrot.slane %v281_v22, %v3917_v16  ;;  %v612_v22 = vld [vmem:[#allocation8 + $0x48] sm:$0xff]  ;;  %v3981_v44 = vrot.slane %v2421_v15, 5 }
 0x172   :  { %5095 = vst [vmem:[#allocation25_spill] sm:$0xff] %v3919_v26  ;;  %v373_v33 = vmul.f32 %v3919_v26, %v3919_v26  ;;  %v3163_v32 = vpack.c.bf16 %v612_v22, %v611_v19  ;;  %v4038_v19 = vld [vmem:[#allocation8 + $0x208] sm:$0xff] }
 0x173   :  { %v581_v38 = vrot.slane %v3925_v29, %v3917_v16  ;;  %2906 = vmatmul.mubr.f32.vlgmr.msra.gmra.mrb[0].mxu1 %v285_v28  ;;  %v574_v12 = vcombine.high %v3925_v29, %v3925_v29  ;;  %v3972_v28 = vrot.slane %v2420_v11, 5  ;;  %v776_v29 = vrot.slane %v2420_v11, 1  ;;  %v4024_v11 = vld [vmem:[#allocation8 + $0x100] sm:$0xff] }
 0x174   :  { %3116 = vmatpush3.bf16.msra.mxu1 %v3113_v3  ;;  %2941 = vmatmul.mubr.f32.vlgmr.msra.gmra.mrb[2].mxu0 %v373_v33  ;;  %v3157_v3 = vpack.c.bf16 %v626_v57, %v625_v56  ;;  %v3133_v33 = vpack.c.bf16 %v472_v24, %v471_v23  ;;  %v3997_v56 = vrot.slane %v2422_v35, 7  ;;  %v5031_v57 = vrot.slane %v3979_v36, 7 }
 0x175   :  { %v592_v45 = vrot.slane %v581_v38, %v3909_v10  ;;  %3148 = vmatpush3.bf16.msra.mxu0 %v3147_v30  ;;  %3118 = vmatprep.subr.bf16.mxu1 %v3117_v31  ;;  %5100 = vst [vmem:[#allocation26_spill] sm:$0xff] %v3972_v28  ;;  %v3974_v30 = vrot.slane %v2421_v15, 1  ;;  %v614_v38 = vld [vmem:[#allocation8 + $0x58] sm:$0xff]  ;;  %v782_v52 = vmul.f32 0.0, %v776_v29  ;;  %v4020_v8 = vsel %vm749_vm8, %v3972_v28, %v3981_v44 }
 0x176   :  { %3150 = vmatprep.subr.bf16.mxu0 %v3149_v34  ;;  %2975 = vmatprep.mubr.f32.mxu1 %v146_v41  ;;  %v613_v34 = vld [vmem:[#allocation8 + $0x50] sm:$0xff]  ;;  %5101 = vst [vmem:[#allocation27_spill] sm:$0xff] %v3997_v56  ;;  %v4053_v23 = vsel %vm787_vm9, %v3997_v56, %v5031_v57  ;;  %v3171_v24 = vpack.c.bf16 %v3992_v48, %v3990_v0 }
 0x177   :  { %v3939_v54 = vmul.f32 %v592_v45, %v146_v41  ;;  %v3942_v55 = vmul.f32 %v592_v45, %v3931_v42  ;;  %v631_v41 = vld [vmem:[#allocation8 + $0xe0] sm:$0xff]  ;;  %v756_v45 = vmul.f32 0.0, %v3972_v28  ;;  %v3167_v58 = vpack.c.bf16 %v614_v38, %v613_v34  ;;  %5103 = vst [vmem:[#allocation29_spill] sm:$0xff] %v4053_v23  ;;  %v4076_v38 = vld [vmem:[#allocation8 + $0x298] sm:$0xff]  ;;  %v4091_v48 = vld [vmem:[#allocation8 + $0x210] sm:$0xff] }
 0x178   :  { %3120 = vmatpush3.bf16.msra.mxu1 %v3117_v31  ;;  %v588_v31 = vrot.slane %v574_v12, %v3917_v16  ;;  %v3169_v2 = vpack.c.bf16 %v632_v43, %v631_v41  ;;  %v4026_v12 = vld [vmem:[#allocation8 + $0x108] sm:$0xff]  ;;  %v4047_v22 = vrot.slane %v782_v52, 4  ;;  %v3177_v43 = vpack.c.bf16 %v4010_v6, %v4008_v5  ;;  %v4144_v57 = vld [vmem:[#allocation8 + $0x130] sm:$0xff] }
 0x179   :  { %3152 = vmatpush3.bf16.msra.mxu0 %v3151_v46  ;;  %3122 = vmatprep.subr.bf16.mxu1 %v3121_v47  ;;  %v815_v62 = vrot.slane %v3939_v54, 1  ;;  %v3954_v63 = vrot.slane %v3942_v55, 1  ;;  %v3984_v46 = vld [vmem:[#allocation5 + $0x10] sm:$0xff]  ;;  %v4022_v9 = vrot.slane %v756_v45, 3  ;;  %v4070_v34 = vmul.f32 %v4020_v8, %v3939_v54 }
 0x17a   :  { %3154 = vmatprep.subr.bf16.mxu0 %v3153_v49  ;;  %v475_v49 = vld [vmem:[#allocation14 + $0x70] sm:$0xff]  ;;  %v596_v50 = vrot.slane %v588_v31, %v3909_v10  ;;  %v4062_v31 = vld [vmem:[#allocation8 + $0x198] sm:$0xff]  ;;  %v3179_v45 = vpack.c.bf16 %v4026_v12, %v4024_v11  ;;  %v4118_v11 = vld [vmem:[#allocation8 + $0x2a0] sm:$0xff] }
 0x17b   :  { %v816_v1 = vsel %vm775_vm4, %v3937_v53, %v815_v62  ;;  %v818_v7 = vsel %vm775_vm4, %v815_v62, %v3954_v63  ;;  %v4002_v62 = vld [vmem:[#allocation8 + $0xf8] sm:$0xff]  ;;  %v4120_v12 = vld [vmem:[#allocation8 + $0x2a8] sm:$0xff] }
 0x17c   :  { %3124 = vmatpush3.bf16.msra.mxu1 %v3121_v47  ;;  %v903_v13 = vrot.slane %v816_v1, 3  ;;  %v3965_v14 = vrot.slane %v818_v7, 3  ;;  %v3988_v47 = vsel %vm775_vm4, %v776_v29, %v3974_v30  ;;  %v4012_v1 = vrot.slane %v2422_v35, 3  ;;  %v4060_v29 = vld [vmem:[#allocation8 + $0x190] sm:$0xff]  ;;  %v4072_v35 = vld [vmem:[#allocation8 + $0x118] sm:$0xff] }
 0x17d   :  { %3156 = vmatpush3.bf16.msra.mxu0 %v3155_v60  ;;  %3126 = vmatprep.subr.bf16.mxu1 %v3125_v61  ;;  %v476_v60 = vld [vmem:[#allocation14 + $0x78] sm:$0xff]  ;;  %v4015_v7 = vrot.slane %v3979_v36, 3  ;;  %v4032_v15 = vmul.f32 %v3988_v47, %v3939_v54  ;;  %v4058_v27 = vmul.f32 %v596_v50, %v3995_v51 }
 0x17e   :  { %3158 = vmatprep.subr.bf16.mxu0 %v3157_v3  ;;  %v905_v20 = vsel %vm763_vm5, %v903_v13, %v3965_v14  ;;  %v4004_v3 = vld [vmem:[#allocation8 + $0x70] sm:$0xff]  ;;  %5102 = vst [vmem:[#allocation28_spill] sm:$0xff] %v4012_v1  ;;  %v4028_v13 = vld [vmem:[#allocation8 + $0x280] sm:$0xff]  ;;  %v3141_v25 = vpack.c.bf16 %v476_v60, %v475_v49  ;;  %v4093_v49 = vld [vmem:[#allocation8 + $0x218] sm:$0xff] }
 0x17f   :  { %1084 = vmatprep.mubr.f32.mxu0 %v905_v20  ;;  %v4041_v20 = vmul.f32 %v596_v50, %v3984_v46  ;;  %v4081_v39 = vsel %vm763_vm5, %v4012_v1, %v4015_v7  ;;  %v806_v40 = vmul.f32 0.0, %v4015_v7  ;;  %v3175_v41 = vpack.c.bf16 %v4006_v4, %v4004_v3  ;;  %v4095_v50 = vld [vmem:[#allocation8 + $0x1a0] sm:$0xff]  ;;  %v4107_v3 = vld [vmem:[#allocation8 + $0x128] sm:$0xff] }
 0x180   :  { %3128 = vmatpush3.bf16.msra.mxu1 %v3125_v61  ;;  %v4000_v61 = vld [vmem:[#allocation8 + $0xf0] sm:$0xff]  ;;  %v845_v0 = vrot.slane %v4032_v15, 4  ;;  %v758_v4 = vmul.f32 %v3981_v44, %v3942_v55  ;;  %v4116_v6 = vrot.slane %v4058_v27, 1 }
 0x181   :  { %3160 = vmatpush3.bf16.msra.mxu0 %v3159_v17  ;;  %3130 = vmatprep.subr.bf16.mxu1 %v3129_v18  ;;  %v4034_v17 = vld [vmem:[#allocation8 + $0x288] sm:$0xff]  ;;  %v4173_v16 = vmul.f32 %v4020_v8, %v4041_v20 }
 0x182   :  { %3162 = vmatprep.subr.bf16.mxu0 %v3161_v21  ;;  %v4045_v21 = vmul.f32 %v3974_v30, %v3942_v55  ;;  %v3209_v52 = vpack.c.bf16 %v4034_v17, %v4028_v13  ;;  %v901_v13 = vrot.slane %v4070_v34, 3  ;;  %v4146_v17 = vld [vmem:[#allocation8 + $0x138] sm:$0xff]  ;;  %v4157_v34 = vmul.f32 %v3997_v56, %v3939_v54 }
 0x183   :  { %v926_v10 = vrot.slane %v758_v4, 3 }
 0x184   :  { %3132 = vmatpush3.bf16.msra.mxu1 %v3129_v18  ;;  %v4036_v18 = vld [vmem:[#allocation8 + $0x200] sm:$0xff]  ;;  %v5034_v60 = vrot.slane %v4045_v21, 4  ;;  %v902_v26 = vsel %vm763_vm5, %v4022_v9, %v901_v13 }
 0x185   :  { %3164 = vmatpush3.bf16.msra.mxu0 %v3163_v32  ;;  %3134 = vmatprep.subr.bf16.mxu1 %v3133_v33  ;;  %v4064_v32 = vld [vmem:[#allocation8 + $0x110] sm:$0xff] }
 0x186   :  { %3166 = vmatprep.subr.bf16.mxu0 %v3165_v37  ;;  %v4074_v37 = vld [vmem:[#allocation8 + $0x290] sm:$0xff] }
 0x187   :  { %v3213_v15 = vpack.c.bf16 %v4076_v38, %v4074_v37  ;;  %v4142_v38 = vld [vmem:[#allocation8 + $0x1b8] sm:$0xff]  ;;  %v4161_v37 = vmul.f32 %v4053_v23, %v3942_v55 }
 0x188   :  { %3136 = vmatpush3.bf16.msra.mxu1 %v3133_v33  ;;  %v3173_v33 = vpack.c.bf16 %v4002_v62, %v4000_v61  ;;  %v819_v61 = vrot.slane %v4041_v20, 1  ;;  %v4103_v62 = vld [vmem:[#allocation8 + $0x1a8] sm:$0xff] }
 0x189   :  { %3168 = vmatpush3.bf16.msra.mxu0 %v3167_v58  ;;  %3138 = vmatprep.subr.bf16.mxu1 %v3137_v59  ;;  %v3211_v58 = vpack.c.bf16 %v4038_v19, %v4036_v18  ;;  %v4127_v18 = vld [vmem:[#allocation8 + $0x220] sm:$0xff]  ;;  %v4129_v19 = vld [vmem:[#allocation8 + $0x228] sm:$0xff] }
 0x18a   :  { %3170 = vmatprep.subr.bf16.mxu0 %v3169_v2  ;;  %v4105_v2 = vld [vmem:[#allocation8 + $0x120] sm:$0xff]  ;;  %v820_v5 = vsel %vm775_vm4, %v3937_v53, %v819_v61 }
 0x18c   :  { %3140 = vmatpush3.bf16.msra.mxu1 %v3137_v59  ;;  %v3181_v59 = vpack.c.bf16 %v4062_v31, %v4060_v29  ;;  %v4133_v29 = vrot.slane %v806_v40, 2  ;;  %v928_v31 = vrot.slane %v3954_v63, 3  ;;  %v4151_v40 = vsel %vm843_vm10, %v845_v0, %v5034_v60 }
 0x18d   :  { %3172 = vmatpush3.bf16.msra.mxu0 %v3171_v24  ;;  %3142 = vmatprep.subr.bf16.mxu1 %v3141_v25  ;;  %v4131_v24 = vld [vmem:[#allocation8 + $0x1b0] sm:$0xff]  ;;  %v865_v60 = vrot.slane %v4157_v34, 6  ;;  %v4214_v34 = vmul.f32 %v4020_v8, %v3942_v55 }
 0x18e   :  { %3174 = vmatprep.subr.bf16.mxu0 %v3173_v33  ;;  %5104 = vst [vmem:[#allocation30_spill] sm:$0xff] %v4133_v29  ;;  %v846_v33 = vsel %vm843_vm10, %v4047_v22, %v845_v0  ;;  %v3217_v0 = vpack.c.bf16 %v4120_v12, %v4118_v11  ;;  %v5044_v11 = vrot.slane %v4151_v40, 3  ;;  %v946_v12 = vrot.slane %v820_v5, 3 }
 0x18f   :  { %v909_v4 = vrot.slane %v846_v33, 3  ;;  %v944_v5 = vrot.slane %v4173_v16, 3  ;;  %v690_v33 = vld [vmem:[#allocation8 + $0x2b8] sm:$0xff] }
 0x190   :  { %3144 = vmatpush3.bf16.msra.mxu1 %v3141_v25  ;;  %v822_v25 = vsel %vm775_vm4, %v819_v61, %v4116_v6  ;;  %v929_v61 = vsel %vm763_vm5, %v3965_v14, %v928_v31 }
 0x191   :  { %3176 = vmatpush3.bf16.msra.mxu0 %v3175_v41  ;;  %3178 = vmatprep.subr.bf16.mxu1 %v3177_v43  ;;  %v5045_v41 = vrot.slane %v4161_v37, 6  ;;  %v4190_v43 = vsel %vm775_vm4, %v3954_v63, %v3937_v53  ;;  %v971_v63 = vrot.slane %v4116_v6, 3 }
 0x192   :  { %3210 = vmatprep.subr.bf16.mxu0 %v3209_v52  ;;  %v4183_v52 = vrot.slane %v822_v25, 3  ;;  %v5038_v31 = vrot.slane %v4190_v43, 3  ;;  %v5105_v25 = vpack.c.bf16 %v4072_v35, %v4064_v32  ;;  %v5041_v35 = vrot.slane %v4214_v34, 3 }
 0x193   :  { %2976 = vmatmul.mubr.f32.vlgmr.msra.gmra.mrb[2].mxu1 %v3931_v42  ;;  %v927_v42 = vsel %vm763_vm5, %v901_v13, %v926_v10  ;;  %v799_v10 = vmul.f32 %v3972_v28, %v3939_v54  ;;  %v689_v13 = vld [vmem:[#allocation8 + $0x2b0] sm:$0xff] }
 0x194   :  { %1085 = vmatmul.mubr.f32.vlgmr.msra.gmra.mrb[4].mxu0 %v902_v26  ;;  %3180 = vmatpush3.bf16.msra.mxu1 %v3179_v45  ;;  %v804_v26 = vmul.f32 %v4012_v1, %v3939_v54  ;;  %v805_v45 = vmul.f32 %v4081_v39, %v3942_v55 }
 0x195   :  { %1089 = vmatprep.mubr.f32.mxu0 %v929_v61  ;;  %3212 = vmatpush3.bf16.msra.mxu0 %v3211_v58  ;;  %v760_v58 = vmul.f32 %v3981_v44, %v4058_v27  ;;  %v918_v61 = vrot.slane %v799_v10, 3  ;;  %v3221_v10 = vpack.c.bf16 %v690_v33, %v689_v13  ;;  %v691_v33 = vld [vmem:[#allocation8 + $0x2c0] sm:$0xff] }
 0x196   :  { %2978 = vmatprep.mubr.f32.mxu1 %v3984_v46  ;;  %3182 = vmatprep.subr.bf16.mxu1 %v3181_v59  ;;  %v4210_v46 = vsel %vm763_vm5, %v3965_v14, %v5038_v31  ;;  %v881_v16 = vrot.slane %v804_v26, 2  ;;  %v882_v59 = vrot.slane %v805_v45, 2  ;;  %v4227_v14 = vsel %vm864_vm11, %v865_v60, %v5045_v41  ;;  %v674_v31 = vld [vmem:[#allocation8 + $0x238] sm:$0xff]  ;;  %v732_v41 = vld [vmem:[#allocation8 + $0x408] sm:$0xff] }
 0x197   :  { %2979 = vmatmul.mubr.f32.gmra.mrb[4].mxu1 %v3995_v51  ;;  %3214 = vmatprep.subr.bf16.mxu0 %v3213_v15  ;;  %v911_v51 = vsel %vm763_vm5, %v909_v4, %v5044_v11  ;;  %v948_v15 = vsel %vm763_vm5, %v946_v12, %v4183_v52  ;;  %v4238_v4 = vsel %vm775_vm4, %v4116_v6, %v3937_v53  ;;  %v969_v45 = vrot.slane %v760_v58, 3  ;;  %v673_v6 = vld [vmem:[#allocation8 + $0x230] sm:$0xff]  ;;  %v700_v11 = vld [vmem:[#allocation8 + $0x308] sm:$0xff] }
 0x198   :  { %1090 = vmatmul.mubr.f32.gmra.mrb[6].mxu0 %v927_v42  ;;  %3184 = vmatpush3.bf16.msra.mxu1 %v5105_v25  ;;  %v883_v42 = vsel %vm828_vm12, %v881_v16, %v882_v59  ;;  %v4232_v32 = vsel %vm828_vm12, %v882_v59, %v4133_v29  ;;  %v5106_v12 = vpack.c.bf16 %v4093_v49, %v4091_v48  ;;  %v659_v16 = vld [vmem:[#allocation8 + $0x1c0] sm:$0xff]  ;;  %v660_v59 = vld [vmem:[#allocation8 + $0x1c8] sm:$0xff]  ;;  %v5039_v49 = vrot.slane %v4238_v4, 3 }
 0x199   :  { %1169 = vmatprep.mubr.f32.mxu1 %v911_v51  ;;  %1094 = vmatprep.mubr.f32.mxu0 %v948_v15  ;;  %v5107_v26 = vpack.c.bf16 %v4103_v62, %v4095_v50  ;;  %v923_v25 = vrot.slane %v883_v42, 3  ;;  %v5042_v51 = vrot.slane %v4232_v32, 3  ;;  %v945_v15 = vsel %vm763_vm5, %v4022_v9, %v944_v5  ;;  %v692_v42 = vld [vmem:[#allocation8 + $0x2c8] sm:$0xff] }
 0x19a   :  { %3216 = vmatpush3.bf16.msra.mxu0 %v5106_v12  ;;  %v4252_v48 = vsel %vm763_vm5, %v918_v61, %v5041_v35  ;;  %v802_v50 = vmul.f32 %v3972_v28, %v4041_v20  ;;  %v5108_v62 = vpack.c.bf16 %v4107_v3, %v4105_v2  ;;  %v915_v58 = vrot.slane %v865_v60, 3  ;;  %v643_v3 = vld [vmem:[#allocation8 + $0x140] sm:$0xff] }
 0x19b   :  { %3186 = vmatprep.subr.bf16.mxu1 %v5107_v26  ;;  %3218 = vmatprep.subr.bf16.mxu0 %v3217_v0  ;;  %v972_v0 = vsel %vm763_vm5, %v4183_v52, %v971_v63  ;;  %v5043_v13 = vrot.slane %v4227_v14, 3  ;;  %v4266_v61 = vsel %vm763_vm5, %v923_v25, %v5042_v51  ;;  %v5109_v12 = vpack.c.bf16 %v4142_v38, %v4131_v24  ;;  %v644_v26 = vld [vmem:[#allocation8 + $0x148] sm:$0xff]  ;;  %v661_v24 = vld [vmem:[#allocation8 + $0x1d0] sm:$0xff]  ;;  %v662_v38 = vld [vmem:[#allocation8 + $0x1d8] sm:$0xff] }
 0x19c   :  { %1095 = vmatmul.mubr.f32.gmra.mrb[8].mxu0 %v945_v15  ;;  %3188 = vmatpush3.bf16.msra.mxu1 %v5108_v62  ;;  %v3193_v2 = vpack.c.bf16 %v660_v59, %v659_v16  ;;  %v4275_v60 = vsel %vm763_vm5, %v4183_v52, %v5039_v49  ;;  %v4279_v63 = vmul.f32 %v4020_v8, %v4058_v27  ;;  %v961_v16 = vrot.slane %v802_v50, 3 }
 0x19d   :  { %1099 = vmatprep.mubr.f32.mxu0 %v972_v0  ;;  %3190 = vmatprep.subr.bf16.mxu1 %v5109_v12  ;;  %v5110_v25 = vpack.c.bf16 %v4129_v19, %v4127_v18  ;;  %v3223_v15 = vpack.c.bf16 %v674_v31, %v673_v6  ;;  %v970_v59 = vsel %vm763_vm5, %v944_v5, %v969_v45  ;;  %v675_v0 = vld [vmem:[#allocation8 + $0x240] sm:$0xff]  ;;  %v676_v12 = vld [vmem:[#allocation8 + $0x248] sm:$0xff]  ;;  %v693_v31 = vld [vmem:[#allocation8 + $0x2d0] sm:$0xff] }
 0x19e   :  { %v3225_v62 = vpack.c.bf16 %v692_v42, %v691_v33  ;;  %v5040_v52 = vrot.slane %v4279_v63, 3  ;;  %v5111_v49 = vpack.c.bf16 %v4146_v17, %v4144_v57  ;;  %v917_v18 = vsel %vm763_vm5, %v915_v58, %v5043_v13  ;;  %v694_v6 = vld [vmem:[#allocation8 + $0x2d8] sm:$0xff]  ;;  %v645_v45 = vld [vmem:[#allocation8 + $0x150] sm:$0xff]  ;;  %v663_v17 = vld [vmem:[#allocation8 + $0x1e0] sm:$0xff] }
 0x19f   :  { %3220 = vmatpush3.bf16.msra.mxu0 %v5110_v25  ;;  %v3195_v19 = vpack.c.bf16 %v644_v26, %v643_v3  ;;  %v3197_v5 = vpack.c.bf16 %v662_v38, %v661_v24  ;;  %v3227_v57 = vpack.c.bf16 %v676_v12, %v675_v0  ;;  %v770_v33 = vmul.f32 0.0, %v4012_v1  ;;  %v678_v3 = vld [vmem:[#allocation8 + $0x258] sm:$0xff]  ;;  %v695_v24 = vld [vmem:[#allocation8 + $0x2e0] sm:$0xff]  ;;  %v648_v12 = vld [vmem:[#allocation8 + $0x168] sm:$0xff] }
 0x1a0   :  { %3222 = vmatprep.subr.bf16.mxu0 %v3221_v10  ;;  %1100 = vmatmul.mubr.f32.gmra.mrb[10].mxu0 %v970_v59  ;;  %v646_v10 = vld [vmem:[#allocation8 + $0x158] sm:$0xff]  ;;  %v4295_v50 = vsel %vm763_vm5, %v961_v16, %v5040_v52  ;;  %v771_v58 = vmul.f32 %v4081_v39, %v3939_v54  ;;  %v3229_v42 = vpack.c.bf16 %v694_v6, %v693_v31  ;;  %v5112_v38 = vrot.slane %v3979_v36, 7  ;;  %v647_v0 = vld [vmem:[#allocation8 + $0x160] sm:$0xff]  ;;  %v680_v31 = vld [vmem:[#allocation8 + $0x268] sm:$0xff] }
 0x1a1   :  { %3192 = vmatpush3.bf16.msra.mxu1 %v5111_v49  ;;  %1254 = vmatprep.mubr.f32.mxu0 %v917_v18  ;;  %v664_v49 = vld [vmem:[#allocation8 + $0x1e8] sm:$0xff]  ;;  %v4302_v26 = vmul.f32 %v4015_v7, %v3942_v55  ;;  %v3199_v25 = vpack.c.bf16 %v646_v10, %v645_v45  ;;  %v679_v18 = vld [vmem:[#allocation8 + $0x260] sm:$0xff]  ;;  %v665_v6 = vld [vmem:[#allocation8 + $0x1f0] sm:$0xff]  ;;  %v4306_v35 = vrot.slane %v770_v33, 2  ;;  %v4317_v33 = vmul.f32 %v3974_v30, %v4058_v27 }
 0x1a2   :  { %3194 = vmatprep.subr.bf16.mxu1 %v3193_v2  ;;  %v677_v2 = vld [vmem:[#allocation8 + $0x250] sm:$0xff]  ;;  %v796_v16 = vmul.f32 0.0, %v5112_v38  ;;  %v3201_v59 = vpack.c.bf16 %v664_v49, %v663_v17  ;;  %v666_v52 = vld [vmem:[#allocation8 + $0x1f8] sm:$0xff]  ;;  %v830_v51 = vrot.slane %v771_v58, 2  ;;  %v3235_v58 = vpack.c.bf16 %v680_v31, %v679_v18  ;;  %v4323_v13 = vld [vmem:[#allocation8 + $0x300] sm:$0xff] }
 0x1a3   :  { %3224 = vmatpush3.bf16.msra.mxu0 %v3223_v15  ;;  %v696_v15 = vld [vmem:[#allocation8 + $0x2e8] sm:$0xff]  ;;  %v649_v45 = vld [vmem:[#allocation8 + $0x170] sm:$0xff]  ;;  %v650_v10 = vld [vmem:[#allocation8 + $0x178] sm:$0xff]  ;;  %v5046_v36 = vrot.slane %v4302_v26, 2  ;;  %v773_v31 = vmul.f32 %v4081_v39, %v4041_v20 }
 0x1a4   :  { %3226 = vmatprep.subr.bf16.mxu0 %v3225_v62  ;;  %v3231_v62 = vpack.c.bf16 %v678_v3, %v677_v2  ;;  %v697_v17 = vld [vmem:[#allocation8 + $0x2f0] sm:$0xff]  ;;  %v698_v49 = vld [vmem:[#allocation8 + $0x2f8] sm:$0xff]  ;;  %v785_v2 = vmul.f32 %v3988_v47, %v4041_v20 }
 0x1a5   :  { %3196 = vmatpush3.bf16.msra.mxu1 %v3195_v19  ;;  %v3233_v19 = vpack.c.bf16 %v696_v15, %v695_v24  ;;  %v4309_v38 = vld [vmem:[#allocation8 + $0x270] sm:$0xff]  ;;  %v682_v3 = vld [vmem:[#allocation8 + $0x278] sm:$0xff]  ;;  %v715_v24 = vld [vmem:[#allocation8 + $0x380] sm:$0xff]  ;;  %v853_v15 = vrot.slane %v3939_v54, 5  ;;  %v3237_v54 = vpack.c.bf16 %v698_v49, %v697_v17  ;;  %v4336_v18 = vsel %vm828_vm12, %v830_v51, %v5046_v36 }
 0x1a6   :  { %3198 = vmatprep.subr.bf16.mxu1 %v3197_v5  ;;  %v3203_v5 = vpack.c.bf16 %v648_v12, %v647_v0  ;;  %v831_v12 = vsel %vm828_vm12, %v4306_v35, %v830_v51  ;;  %v718_v17 = vld [vmem:[#allocation8 + $0x398] sm:$0xff]  ;;  %v849_v49 = vrot.slane %v785_v2, 4  ;;  %v5053_v0 = vrot.slane %v4317_v33, 4 }
 0x1a7   :  { %3228 = vmatpush3.bf16.msra.mxu0 %v3227_v57  ;;  %v4311_v57 = vrot.slane %v796_v16, 6  ;;  %v3207_v16 = vpack.c.bf16 %v650_v10, %v649_v45  ;;  %v3239_v45 = vpack.c.bf16 %v682_v3, %v4309_v38  ;;  %v906_v51 = vrot.slane %v831_v12, 3 }
 0x1a8   :  { %3230 = vmatprep.subr.bf16.mxu0 %v3229_v42  ;;  %v3205_v42 = vpack.c.bf16 %v666_v52, %v665_v6  ;;  %v4331_v52 = vmul.f32 %v4053_v23, %v4058_v27  ;;  %v4342_v6 = vmul.f32 %v4015_v7, %v4058_v27  ;;  %v5114_v36 = vrot.slane %v4045_v21, 4 }
 0x1a9   :  { %3200 = vmatpush3.bf16.msra.mxu1 %v3199_v25  ;;  %5113 = vst [vmem:[#allocation31_spill] sm:$0xff] %v4311_v57  ;;  %v716_v25 = vld [vmem:[#allocation8 + $0x388] sm:$0xff]  ;;  %v5115_v23 = vrot.slane %v3942_v55, 5  ;;  %v907_v38 = vrot.slane %v4336_v18, 3  ;;  %v5116_v2 = vrot.slane %v4161_v37, 6  ;;  %v834_v12 = vrot.slane %v773_v31, 2 }
 0x1aa   :  { %3202 = vmatprep.subr.bf16.mxu1 %v3201_v59  ;;  %v4327_v59 = vmul.f32 %v3997_v56, %v4041_v20  ;;  %v3241_v10 = vpack.c.bf16 %v716_v25, %v715_v24  ;;  %v932_v28 = vrot.slane %v5114_v36, 3  ;;  %v734_v24 = vld [vmem:[#allocation8 + $0x418] sm:$0xff]  ;;  %v871_v36 = vrot.slane %v4331_v52, 6  ;;  %v720_v31 = vld [vmem:[#allocation8 + $0x3a8] sm:$0xff] }
 0x1ab   :  { %3232 = vmatpush3.bf16.msra.mxu0 %v3231_v62  ;;  %v731_v62 = vld [vmem:[#allocation8 + $0x400] sm:$0xff]  ;;  %v4351_v56 = vsel %vm749_vm8, %v853_v15, %v5115_v23  ;;  %v869_v3 = vsel %vm864_vm11, %v5116_v2, %v4311_v57  ;;  %v850_v37 = vsel %vm843_vm10, %v4047_v22, %v849_v49  ;;  %v4368_v18 = vsel %vm843_vm10, %v849_v49, %v5053_v0 }
 0x1ac   :  { %3234 = vmatprep.subr.bf16.mxu0 %v3233_v19  ;;  %v717_v19 = vld [vmem:[#allocation8 + $0x390] sm:$0xff]  ;;  %v870_v21 = vrot.slane %v4327_v59, 6  ;;  %v3273_v25 = vpack.c.bf16 %v732_v41, %v731_v62  ;;  %v936_v52 = vrot.slane %v869_v3, 3  ;;  %v702_v41 = vld [vmem:[#allocation8 + $0x318] sm:$0xff]  ;;  %v719_v62 = vld [vmem:[#allocation8 + $0x3a0] sm:$0xff]  ;;  %v5118_v49 = vrot.slane %v4302_v26, 2 }
 0x1ad   :  { %3204 = vmatpush3.bf16.msra.mxu1 %v3203_v5  ;;  %v3243_v5 = vpack.c.bf16 %v700_v11, %v4323_v13  ;;  %v3245_v23 = vpack.c.bf16 %v718_v17, %v717_v19  ;;  %v836_v11 = vrot.slane %v4342_v6, 2  ;;  %v912_v13 = vrot.slane %v853_v15, 3  ;;  %v701_v59 = vld [vmem:[#allocation8 + $0x310] sm:$0xff] }
 0x1ae   :  { %3206 = vmatprep.subr.bf16.mxu1 %v3205_v42  ;;  %v733_v42 = vld [vmem:[#allocation8 + $0x410] sm:$0xff]  ;;  %v857_v15 = vrot.slane %v4058_v27, 5  ;;  %v5117_v19 = vrot.slane %v4151_v40, 3  ;;  %v930_v2 = vrot.slane %v5118_v49, 3  ;;  %v952_v3 = vrot.slane %v850_v37, 3  ;;  %v735_v37 = vld [vmem:[#allocation8 + $0x420] sm:$0xff] }
 0x1af   :  { %3236 = vmatpush3.bf16.msra.mxu0 %v3235_v58  ;;  %v913_v58 = vrot.slane %v4351_v56, 3  ;;  %v908_v56 = vsel %vm763_vm5, %v906_v51, %v907_v38  ;;  %v4387_v40 = vsel %vm828_vm12, %v834_v12, %v836_v11  ;;  %v5119_v26 = vrot.slane %v3942_v55, 5  ;;  %v703_v55 = vld [vmem:[#allocation8 + $0x320] sm:$0xff] }
 0x1b0   :  { %3238 = vmatprep.subr.bf16.mxu0 %v3237_v54  ;;  %v3277_v54 = vpack.c.bf16 %v734_v24, %v733_v42  ;;  %v933_v17 = vsel %vm763_vm5, %v5117_v19, %v932_v28  ;;  %v953_v42 = vrot.slane %v4368_v18, 3  ;;  %v3247_v24 = vpack.c.bf16 %v702_v41, %v701_v59  ;;  %v736_v19 = vld [vmem:[#allocation8 + $0x428] sm:$0xff] }
 0x1b1   :  { %3208 = vmatpush3.bf16.msra.mxu1 %v3207_v16  ;;  %v856_v16 = vrot.slane %v4041_v20, 5  ;;  %v914_v28 = vsel %vm763_vm5, %v912_v13, %v913_v58  ;;  %v934_v51 = vrot.slane %v5119_v26, 3  ;;  %v5120_v18 = vrot.slane %v4227_v14, 3  ;;  %v704_v13 = vld [vmem:[#allocation8 + $0x328] sm:$0xff] }
 0x1b2   :  { %3242 = vmatprep.subr.bf16.mxu1 %v3241_v10  ;;  %v4379_v10 = vsel %vm864_vm11, %v870_v21, %v871_v36  ;;  %v958_v0 = vrot.slane %v870_v21, 3  ;;  %v931_v59 = vsel %vm763_vm5, %v907_v38, %v930_v2  ;;  %v950_v14 = vrot.slane %v4387_v40, 3  ;;  %v721_v21 = vld [vmem:[#allocation8 + $0x3b0] sm:$0xff] }
 0x1b3   :  { %3240 = vmatpush3.bf16.msra.mxu0 %v3239_v45  ;;  %v835_v45 = vsel %vm828_vm12, %v4306_v35, %v834_v12  ;;  %v937_v49 = vsel %vm763_vm5, %v5120_v18, %v936_v52  ;;  %v959_v12 = vrot.slane %v4379_v10, 3  ;;  %v722_v52 = vld [vmem:[#allocation8 + $0x3b8] sm:$0xff]  ;;  %v3281_v10 = vpack.c.bf16 %v736_v19, %v735_v37  ;;  %v737_v40 = vld [vmem:[#allocation8 + $0x430] sm:$0xff] }
 0x1b4   :  { %1170 = vmatmul.mubr.f32.vlgmr.msra.gmra.mrb[6].mxu1 %v908_v56  ;;  %3274 = vmatprep.subr.bf16.mxu0 %v3273_v25  ;;  %v3249_v56 = vpack.c.bf16 %v720_v31, %v719_v62  ;;  %v949_v41 = vrot.slane %v835_v45, 3  ;;  %v954_v62 = vsel %vm763_vm5, %v952_v3, %v953_v42  ;;  %v5121_v31 = vrot.slane %v4317_v33, 4  ;;  %v705_v18 = vld [vmem:[#allocation8 + $0x330] sm:$0xff]  ;;  %v706_v33 = vld [vmem:[#allocation8 + $0x338] sm:$0xff] }
 0x1b5   :  { %1174 = vmatprep.mubr.f32.mxu1 %v933_v17  ;;  %3244 = vmatpush3.bf16.msra.mxu1 %v3243_v5  ;;  %v4399_v5 = vsel %vm749_vm8, %v856_v16, %v857_v15  ;;  %v955_v38 = vrot.slane %v856_v16, 3  ;;  %v3251_v45 = vpack.c.bf16 %v704_v13, %v703_v55  ;;  %v3253_v26 = vpack.c.bf16 %v722_v52, %v721_v21  ;;  %v723_v16 = vld [vmem:[#allocation8 + $0x3c0] sm:$0xff]  ;;  %v708_v13 = vld [vmem:[#allocation8 + $0x348] sm:$0xff]  ;;  %v742_v52 = vld [vmem:[#allocation8 + $0x458] sm:$0xff] }
 0x1b6   :  { %1255 = vmatmul.mubr.f32.vlgmr.msra.gmra.mrb[12].mxu0 %v914_v28  ;;  %3246 = vmatprep.subr.bf16.mxu1 %v3245_v23  ;;  %v873_v23 = vsel %vm864_vm11, %v871_v36, %v4311_v57  ;;  %v975_v17 = vrot.slane %v5121_v31, 3  ;;  %v956_v2 = vrot.slane %v4399_v5, 3  ;;  %v738_v36 = vld [vmem:[#allocation8 + $0x438] sm:$0xff]  ;;  %v960_v28 = vsel %vm763_vm5, %v958_v0, %v959_v12  ;;  %v740_v5 = vld [vmem:[#allocation8 + $0x448] sm:$0xff]  ;;  %v707_v55 = vld [vmem:[#allocation8 + $0x340] sm:$0xff] }
 0x1b7   :  { %1259 = vmatprep.mubr.f32.mxu0 %v937_v49  ;;  %3276 = vmatpush3.bf16.msra.mxu0 %v3273_v25  ;;  %v935_v25 = vsel %vm763_vm5, %v913_v58, %v934_v51  ;;  %v979_v3 = vrot.slane %v873_v23, 3  ;;  %v951_v37 = vsel %vm763_vm5, %v949_v41, %v950_v14  ;;  %v973_v58 = vrot.slane %v836_v11, 3  ;;  %v724_v51 = vld [vmem:[#allocation8 + $0x3c8] sm:$0xff]  ;;  %v739_v49 = vld [vmem:[#allocation8 + $0x440] sm:$0xff]  ;;  %v726_v41 = vld [vmem:[#allocation8 + $0x3d8] sm:$0xff] }
 0x1b8   :  { %1175 = vmatmul.mubr.f32.gmra.mrb[8].mxu1 %v931_v59  ;;  %3278 = vmatprep.subr.bf16.mxu0 %v3277_v54  ;;  %v3285_v19 = vpack.c.bf16 %v738_v36, %v737_v40  ;;  %v957_v0 = vsel %vm763_vm5, %v955_v38, %v956_v2  ;;  %v3257_v11 = vpack.c.bf16 %v724_v51, %v723_v16  ;;  %v725_v59 = vld [vmem:[#allocation8 + $0x3d0] sm:$0xff]  ;;  %v711_v40 = vld [vmem:[#allocation8 + $0x360] sm:$0xff]  ;;  %v712_v36 = vld [vmem:[#allocation8 + $0x368] sm:$0xff] }
 0x1b9   :  { %1179 = vmatprep.mubr.f32.mxu1 %v954_v62  ;;  %3248 = vmatpush3.bf16.msra.mxu1 %v3247_v24  ;;  %v976_v24 = vsel %vm763_vm5, %v953_v42, %v975_v17  ;;  %v980_v6 = vsel %vm763_vm5, %v959_v12, %v979_v3  ;;  %v974_v42 = vsel %vm763_vm5, %v950_v14, %v973_v58  ;;  %v741_v12 = vld [vmem:[#allocation8 + $0x450] sm:$0xff]  ;;  %v710_v17 = vld [vmem:[#allocation8 + $0x358] sm:$0xff]  ;;  %v727_v14 = vld [vmem:[#allocation8 + $0x3e0] sm:$0xff] }
 0x1ba   :  { %1260 = vmatmul.mubr.f32.gmra.mrb[14].mxu0 %v935_v25  ;;  %3250 = vmatprep.subr.bf16.mxu1 %v3249_v56  ;;  %v977_v56 = vrot.slane %v857_v15, 3  ;;  %v3289_v23 = vpack.c.bf16 %v740_v5, %v739_v49  ;;  %v3259_v21 = vpack.c.bf16 %v708_v13, %v707_v55  ;;  %v3261_v62 = vpack.c.bf16 %v726_v41, %v725_v59  ;;  %v709_v31 = vld [vmem:[#allocation8 + $0x350] sm:$0xff]  ;;  %v730_v3 = vld [vmem:[#allocation8 + $0x3f8] sm:$0xff] }
 0x1bb   :  { %1264 = vmatprep.mubr.f32.mxu0 %v960_v28  ;;  %3280 = vmatpush3.bf16.msra.mxu0 %v3277_v54  ;;  %v3255_v54 = vpack.c.bf16 %v706_v33, %v705_v18  ;;  %v3293_v25 = vpack.c.bf16 %v742_v52, %v741_v12  ;;  %v3263_v38 = vpack.c.bf16 %v710_v17, %v709_v31  ;;  %v729_v28 = vld [vmem:[#allocation8 + $0x3f0] sm:$0xff]  ;;  %v746_v58 = vld [vmem:[#allocation8 + $0x478] sm:$0xff]  ;;  %v801_v49 = vmul.f32 0.0, %v3981_v44  ;;  %v1546_v31 = vld [vmem:[#allocation11] sm:$0xff] }
 0x1bc   :  { %1180 = vmatmul.mubr.f32.gmra.mrb[10].mxu1 %v951_v37  ;;  %3282 = vmatprep.subr.bf16.mxu0 %v3281_v10  ;;  %v978_v15 = vsel %vm763_vm5, %v956_v2, %v977_v56  ;;  %v743_v2 = vld [vmem:[#allocation8 + $0x460] sm:$0xff]  ;;  %v3267_v33 = vpack.c.bf16 %v712_v36, %v711_v40  ;;  %v745_v37 = vld [vmem:[#allocation8 + $0x470] sm:$0xff]  ;;  %v3269_v16 = vpack.c.bf16 %v730_v3, %v729_v28  ;;  %v4432_v5 = vrot.slane %v3937_v53, 3  ;;  %v1549_v28 = vld [vmem:[#allocation11 + $0x18] sm:$0xff] }
 0x1bd   :  { %1184 = vmatprep.mubr.f32.mxu1 %v976_v24  ;;  %3252 = vmatpush3.bf16.msra.mxu1 %v3251_v45  ;;  %v744_v45 = vld [vmem:[#allocation8 + $0x468] sm:$0xff]  ;;  %v713_v51 = vld [vmem:[#allocation8 + $0x370] sm:$0xff]  ;;  %v714_v24 = vld [vmem:[#allocation8 + $0x378] sm:$0xff]  ;;  %v3301_v56 = vpack.c.bf16 %v746_v58, %v745_v37  ;;  %v4437_v13 = vrot.slane %v801_v49, 3  ;;  %v5126_v41 = vrot.slane %v4232_v32, 3  ;;  %v5128_v32 = vrot.slane %v4238_v4, 3 }
 0x1be   :  { %1265 = vmatmul.mubr.f32.gmra.mrb[16].mxu0 %v957_v0  ;;  %3254 = vmatprep.subr.bf16.mxu1 %v3253_v26  ;;  %v807_v26 = vmul.f32 %v4012_v1, %v4041_v20  ;;  %v3297_v18 = vpack.c.bf16 %v744_v45, %v743_v2  ;;  %v3271_v20 = vpack.c.bf16 %v714_v24, %v713_v51  ;;  %v1578_v4 = vld [vmem:[#allocation11 + $0x100] sm:$0xff]  ;;  %v1579_v2 = vld [vmem:[#allocation11 + $0x108] sm:$0xff]  ;;  %v1548_v36 = vld [vmem:[#allocation11 + $0x10] sm:$0xff] }
 0x1bf   :  { %1269 = vmatprep.mubr.f32.mxu0 %v980_v6  ;;  %3284 = vmatpush3.bf16.msra.mxu0 %v3281_v10  ;;  %v728_v10 = vld [vmem:[#allocation8 + $0x3e8] sm:$0xff]  ;;  %5122 = vst [vmem:[#allocation32_spill] sm:$0xff] %v4432_v5  ;;  %v4435_v6 = vrot.slane %v4133_v29, 3  ;;  %5124 = vst [vmem:[#allocation34_spill] sm:$0xff] %v4437_v13  ;;  %v982_v12 = vsel %vm763_vm5, %v5128_v32, %v4432_v5  ;;  %v3339_v45 = vpack.c.bf16 %v1579_v2, %v1578_v4  ;;  %v1596_v3 = vld [vmem:[#allocation11 + $0x190] sm:$0xff] }
 0x1c0   :  { %1185 = vmatmul.mubr.f32.gmra.mrb[12].mxu1 %v974_v42  ;;  %3286 = vmatprep.subr.bf16.mxu0 %v3285_v19  ;;  %v5125_v42 = vrot.slane %v4190_v43, 3  ;;  %v1567_v51 = vld [vmem:[#allocation11 + $0xa8] sm:$0xff]  ;;  %v1550_v24 = vld [vmem:[#allocation11 + $0x20] sm:$0xff] }
 0x1c1   :  { %3256 = vmatpush3.bf16.msra.mxu1 %v3255_v54  ;;  %1339 = vmatprep.mubr.f32.mxu1 %v4210_v46  ;;  %v3265_v46 = vpack.c.bf16 %v728_v10, %v727_v14  ;;  %5123 = vst [vmem:[#allocation33_spill] sm:$0xff] %v4435_v6  ;;  %v1547_v14 = vld [vmem:[#allocation11 + $0x8] sm:$0xff]  ;;  %v1594_v10 = vld [vmem:[#allocation11 + $0x180] sm:$0xff] }
 0x1c2   :  { %1270 = vmatmul.mubr.f32.gmra.mrb[18].mxu0 %v978_v15  ;;  %3258 = vmatprep.subr.bf16.mxu1 %v3257_v11  ;;  %v941_v59 = vsel %vm763_vm5, %v5125_v42, %v4432_v5  ;;  %v1582_v49 = vld [vmem:[#allocation11 + $0x120] sm:$0xff]  ;;  %v1568_v42 = vld [vmem:[#allocation11 + $0xb0] sm:$0xff]  ;;  %v1587_v2 = vld [vmem:[#allocation11 + $0x148] sm:$0xff] }
 0x1c3   :  { %3288 = vmatpush3.bf16.msra.mxu0 %v3285_v19  ;;  %3013 = vmatprep.mubr.f32.mxu0 %v4266_v61  ;;  %v808_v61 = vmul.f32 %v4081_v39, %v4058_v27  ;;  %v886_v19 = vrot.slane %v807_v26, 2  ;;  %v3311_v26 = vpack.c.bf16 %v1549_v28, %v1548_v36  ;;  %v1586_v4 = vld [vmem:[#allocation11 + $0x140] sm:$0xff]  ;;  %v1556_v36 = vld [vmem:[#allocation11 + $0x50] sm:$0xff]  ;;  %v1557_v28 = vld [vmem:[#allocation11 + $0x58] sm:$0xff] }
 0x1c4   :  { %3290 = vmatprep.subr.bf16.mxu0 %v3289_v23  ;;  %v4594_v1 = vld [vmem:[#allocation11 + $0x3c8] sm:$0xff] }
 0x1c5   :  { %3260 = vmatpush3.bf16.msra.mxu1 %v3259_v21  ;;  %v887_v0 = vrot.slane %v808_v61, 2  ;;  %v5127_v21 = vrot.slane %v4214_v34, 3  ;;  %v5129_v34 = vrot.slane %v4279_v63, 3  ;;  %v1565_v63 = vld [vmem:[#allocation11 + $0x98] sm:$0xff] }
 0x1c6   :  { %3262 = vmatprep.subr.bf16.mxu1 %v3261_v62  ;;  %v1562_v62 = vld [vmem:[#allocation11 + $0x80] sm:$0xff]  ;;  %v1597_v61 = vld [vmem:[#allocation11 + $0x198] sm:$0xff] }
 0x1c7   :  { %3292 = vmatpush3.bf16.msra.mxu0 %v3289_v23  ;;  %v888_v27 = vsel %vm828_vm12, %v886_v19, %v887_v0  ;;  %v889_v54 = vsel %vm828_vm12, %v887_v0, %v4133_v29  ;;  %v943_v23 = vsel %vm763_vm5, %v5126_v41, %v4435_v6  ;;  %v981_v52 = vsel %vm763_vm5, %v5129_v34, %v4437_v13  ;;  %v1551_v0 = vld [vmem:[#allocation11 + $0x28] sm:$0xff]  ;;  %v1552_v41 = vld [vmem:[#allocation11 + $0x30] sm:$0xff]  ;;  %v1585_v34 = vld [vmem:[#allocation11 + $0x138] sm:$0xff] }
 0x1c8   :  { %3294 = vmatprep.subr.bf16.mxu0 %v3293_v25  ;;  %v966_v11 = vrot.slane %v888_v27, 3  ;;  %v967_v55 = vrot.slane %v889_v54, 3  ;;  %v3341_v37 = vpack.c.bf16 %v1597_v61, %v1596_v3  ;;  %v3315_v27 = vpack.c.bf16 %v1551_v0, %v1550_v24  ;;  %v1589_v24 = vld [vmem:[#allocation11 + $0x158] sm:$0xff] }
 0x1c9   :  { %3264 = vmatpush3.bf16.msra.mxu1 %v3263_v38 }
 0x1ca   :  { %3266 = vmatprep.subr.bf16.mxu1 %v3265_v46  ;;  %v968_v15 = vsel %vm763_vm5, %v966_v11, %v967_v55  ;;  %v983_v43 = vsel %vm763_vm5, %v967_v55, %v4435_v6  ;;  %v1564_v46 = vld [vmem:[#allocation11 + $0x90] sm:$0xff]  ;;  %v1583_v11 = vld [vmem:[#allocation11 + $0x128] sm:$0xff] }
 0x1cb   :  { %3296 = vmatpush3.bf16.msra.mxu0 %v3293_v25  ;;  %v1595_v25 = vld [vmem:[#allocation11 + $0x188] sm:$0xff]  ;;  %v3309_v40 = vpack.c.bf16 %v1565_v63, %v1564_v46  ;;  %v3347_v55 = vpack.c.bf16 %v1583_v11, %v1582_v49  ;;  %v3355_v63 = vpack.c.bf16 %v1587_v2, %v1586_v4  ;;  %v1606_v49 = vld [vmem:[#allocation11 + $0x1e0] sm:$0xff] }
 0x1cc   :  { %3298 = vmatprep.subr.bf16.mxu0 %v3297_v18  ;;  %v3337_v38 = vpack.c.bf16 %v1595_v25, %v1594_v10  ;;  %v1602_v10 = vld [vmem:[#allocation11 + $0x1c0] sm:$0xff]  ;;  %v1603_v25 = vld [vmem:[#allocation11 + $0x1c8] sm:$0xff] }
 0x1cd   :  { %3268 = vmatpush3.bf16.msra.mxu1 %v3267_v33  ;;  %v1581_v33 = vld [vmem:[#allocation11 + $0x118] sm:$0xff]  ;;  %v1607_v11 = vld [vmem:[#allocation11 + $0x1e8] sm:$0xff] }
 0x1ce   :  { %3270 = vmatprep.subr.bf16.mxu1 %v3269_v16  ;;  %v1566_v16 = vld [vmem:[#allocation11 + $0xa0] sm:$0xff] }
 0x1cf   :  { %3300 = vmatpush3.bf16.msra.mxu0 %v3297_v18  ;;  %v1580_v18 = vld [vmem:[#allocation11 + $0x110] sm:$0xff]  ;;  %v3313_v19 = vpack.c.bf16 %v1567_v51, %v1566_v16 }
 0x1d0   :  { %3302 = vmatprep.subr.bf16.mxu0 %v3301_v56  ;;  %v3343_v58 = vpack.c.bf16 %v1581_v33, %v1580_v18  ;;  %v3327_v18 = vpack.c.bf16 %v1557_v28, %v1556_v36  ;;  %v1604_v33 = vld [vmem:[#allocation11 + $0x1d0] sm:$0xff] }
 0x1d1   :  { %3272 = vmatpush3.bf16.msra.mxu1 %v3271_v20  ;;  %v1599_v20 = vld [vmem:[#allocation11 + $0x1a8] sm:$0xff]  ;;  %v1588_v51 = vld [vmem:[#allocation11 + $0x150] sm:$0xff] }
 0x1d2   :  { %v3359_v0 = vpack.c.bf16 %v1589_v24, %v1588_v51 }
 0x1d3   :  { %3304 = vmatpush3.bf16.msra.mxu0 %v3301_v56  ;;  %v1598_v56 = vld [vmem:[#allocation11 + $0x1a0] sm:$0xff] }
 0x1d4   :  { %1340 = vmatmul.mubr.f32.vlgmr.msra.gmra.mrb[14].mxu1 %v4252_v48  ;;  %v939_v48 = vsel %vm763_vm5, %v5127_v21, %v4437_v13  ;;  %3338 = vmatprep.subr.bf16.mxu0 %v3337_v38  ;;  %v3345_v54 = vpack.c.bf16 %v1599_v20, %v1598_v56  ;;  %v1600_v21 = vld [vmem:[#allocation11 + $0x1b0] sm:$0xff]  ;;  %v3353_v38 = vpack.c.bf16 %v1603_v25, %v1602_v10  ;;  %v1575_v56 = vld [vmem:[#allocation11 + $0xe8] sm:$0xff]  ;;  %v1558_v20 = vld [vmem:[#allocation11 + $0x60] sm:$0xff] }
 0x1d5   :  { %1344 = vmatprep.mubr.f32.mxu1 %v941_v59  ;;  %v1569_v59 = vld [vmem:[#allocation11 + $0xb8] sm:$0xff]  ;;  %v1658_v10 = vld [vmem:[#allocation11 + $0x380] sm:$0xff]  ;;  %v1659_v25 = vld [vmem:[#allocation11 + $0x388] sm:$0xff] }
 0x1d6   :  { %3014 = vmatmul.mubr.f32.vlgmr.msra.gmra.mrb[20].mxu0 %v943_v23  ;;  %v3317_v23 = vpack.c.bf16 %v1569_v59, %v1568_v42  ;;  %v3361_v59 = vpack.c.bf16 %v1607_v11, %v1606_v49  ;;  %v3401_v4 = vpack.c.bf16 %v1659_v25, %v1658_v10 }
 0x1d7   :  { %3016 = vmatprep.mubr.f32.mxu0 %v968_v15  ;;  %3340 = vmatpush3.bf16.msra.mxu0 %v3339_v45  ;;  %v1553_v15 = vld [vmem:[#allocation11 + $0x38] sm:$0xff]  ;;  %v1572_v45 = vld [vmem:[#allocation11 + $0xd0] sm:$0xff] }
 0x1d8   :  { %1345 = vmatmul.mubr.f32.gmra.mrb[16].mxu1 %v939_v48  ;;  %3342 = vmatprep.subr.bf16.mxu0 %v3341_v37  ;;  %v1601_v48 = vld [vmem:[#allocation11 + $0x1b8] sm:$0xff] }
 0x1d9   :  { %1349 = vmatprep.mubr.f32.mxu1 %v4275_v60  ;;  %v1563_v60 = vld [vmem:[#allocation11 + $0x88] sm:$0xff]  ;;  %v3349_v32 = vpack.c.bf16 %v1601_v48, %v1600_v21  ;;  %v1605_v37 = vld [vmem:[#allocation11 + $0x1d8] sm:$0xff] }
 0x1da   :  { %3017 = vmatmul.mubr.f32.gmra.mrb[22].mxu0 %v983_v43  ;;  %v3305_v17 = vpack.c.bf16 %v1563_v60, %v1562_v62  ;;  %v3319_v43 = vpack.c.bf16 %v1553_v15, %v1552_v41  ;;  %v1570_v62 = vld [vmem:[#allocation11 + $0xc0] sm:$0xff]  ;;  %v1571_v60 = vld [vmem:[#allocation11 + $0xc8] sm:$0xff]  ;;  %v3357_v16 = vpack.c.bf16 %v1605_v37, %v1604_v33  ;;  %v1577_v15 = vld [vmem:[#allocation11 + $0xf8] sm:$0xff] }
 0x1db   :  { %3344 = vmatpush3.bf16.msra.mxu0 %v3343_v58  ;;  %v1591_v41 = vld [vmem:[#allocation11 + $0x168] sm:$0xff] }
 0x1dc   :  { %1350 = vmatmul.mubr.f32.gmra.mrb[18].mxu1 %v4295_v50  ;;  %v3307_v50 = vpack.c.bf16 %v1547_v14, %v1546_v31  ;;  %3306 = vmatprep.subr.bf16.mxu1 %v3305_v17  ;;  %v1554_v31 = vld [vmem:[#allocation11 + $0x40] sm:$0xff]  ;;  %v3321_v17 = vpack.c.bf16 %v1571_v60, %v1570_v62  ;;  %v1555_v14 = vld [vmem:[#allocation11 + $0x48] sm:$0xff]  ;;  %v1593_v62 = vld [vmem:[#allocation11 + $0x178] sm:$0xff] }
 0x1dd   :  { %1354 = vmatprep.mubr.f32.mxu1 %v982_v12  ;;  %3346 = vmatprep.subr.bf16.mxu0 %v3345_v54  ;;  %v1584_v12 = vld [vmem:[#allocation11 + $0x130] sm:$0xff] }
 0x1de   :  { %3308 = vmatpush3.bf16.msra.mxu1 %v3307_v50  ;;  %v3323_v50 = vpack.c.bf16 %v1555_v14, %v1554_v31  ;;  %v1626_v31 = vld [vmem:[#allocation11 + $0x280] sm:$0xff] }
 0x1df   :  { %3310 = vmatprep.subr.bf16.mxu1 %v3309_v40  ;;  %3348 = vmatpush3.bf16.msra.mxu0 %v3347_v55  ;;  %v1573_v40 = vld [vmem:[#allocation11 + $0xd8] sm:$0xff]  ;;  %v1590_v55 = vld [vmem:[#allocation11 + $0x160] sm:$0xff] }
 0x1e0   :  { %1355 = vmatmul.mubr.f32.gmra.mrb[20].mxu1 %v981_v52  ;;  %v3351_v52 = vpack.c.bf16 %v1585_v34, %v1584_v12  ;;  %3350 = vmatprep.subr.bf16.mxu0 %v3349_v32  ;;  %v3325_v61 = vpack.c.bf16 %v1573_v40, %v1572_v45  ;;  %v3363_v21 = vpack.c.bf16 %v1591_v41, %v1590_v55  ;;  %v1561_v32 = vld [vmem:[#allocation11 + $0x78] sm:$0xff]  ;;  %v1608_v12 = vld [vmem:[#allocation11 + $0x1f0] sm:$0xff] }
 0x1e1   :  { %v1609_v34 = vld [vmem:[#allocation11 + $0x1f8] sm:$0xff] }
 0x1e2   :  { %3312 = vmatpush3.bf16.msra.mxu1 %v3311_v26  ;;  %v3365_v60 = vpack.c.bf16 %v1609_v34, %v1608_v12 }
 0x1e3   :  { %3314 = vmatprep.subr.bf16.mxu1 %v3313_v19  ;;  %3352 = vmatpush3.bf16.msra.mxu0 %v3351_v52  ;;  %v1574_v19 = vld [vmem:[#allocation11 + $0xe0] sm:$0xff]  ;;  %v1592_v52 = vld [vmem:[#allocation11 + $0x170] sm:$0xff] }
 0x1e4   :  { %3354 = vmatprep.subr.bf16.mxu0 %v3353_v38  ;;  %v3329_v54 = vpack.c.bf16 %v1575_v56, %v1574_v19 }
 0x1e6   :  { %3316 = vmatpush3.bf16.msra.mxu1 %v3315_v27  ;;  %v1559_v27 = vld [vmem:[#allocation11 + $0x68] sm:$0xff] }
 0x1e7   :  { %3318 = vmatprep.subr.bf16.mxu1 %v3317_v23  ;;  %3356 = vmatpush3.bf16.msra.mxu0 %v3355_v63  ;;  %v3331_v42 = vpack.c.bf16 %v1559_v27, %v1558_v20  ;;  %v1576_v23 = vld [vmem:[#allocation11 + $0xf0] sm:$0xff] }
 0x1e8   :  { %3358 = vmatprep.subr.bf16.mxu0 %v3357_v16  ;;  %v3333_v48 = vpack.c.bf16 %v1577_v15, %v1576_v23 }
 0x1ea   :  { %3320 = vmatpush3.bf16.msra.mxu1 %v3319_v43  ;;  %v1560_v43 = vld [vmem:[#allocation11 + $0x70] sm:$0xff] }
 0x1eb   :  { %3322 = vmatprep.subr.bf16.mxu1 %v3321_v17  ;;  %3360 = vmatpush3.bf16.msra.mxu0 %v3359_v0  ;;  %v1627_v17 = vld [vmem:[#allocation11 + $0x288] sm:$0xff]  ;;  %v3335_v14 = vpack.c.bf16 %v1561_v32, %v1560_v43 }
 0x1ec   :  { %3362 = vmatprep.subr.bf16.mxu0 %v3361_v59  ;;  %v3369_v38 = vpack.c.bf16 %v1627_v17, %v1626_v31 }
 0x1ee   :  { %3324 = vmatpush3.bf16.msra.mxu1 %v3323_v50  ;;  %v3367_v50 = vpack.c.bf16 %v1593_v62, %v1592_v52 }
 0x1ef   :  { %3326 = vmatprep.subr.bf16.mxu1 %v3325_v61  ;;  %3364 = vmatpush3.bf16.msra.mxu0 %v3363_v21 }
 0x1f0   :  { %3366 = vmatprep.subr.bf16.mxu0 %v3365_v60 }
 0x1f2   :  { %3328 = vmatpush3.bf16.msra.mxu1 %v3327_v18 }
 0x1f3   :  { %3330 = vmatprep.subr.bf16.mxu1 %v3329_v54  ;;  %3368 = vmatpush3.bf16.msra.mxu0 %v3367_v50 }
 0x1f4   :  { %3402 = vmatprep.subr.bf16.mxu0 %v3401_v4 }
 0x1f6   :  { %3332 = vmatpush3.bf16.msra.mxu1 %v3331_v42 }
 0x1f7   :  { %3334 = vmatprep.subr.bf16.mxu1 %v3333_v48 }
 0x1fa   :  { %3336 = vmatpush3.bf16.msra.mxu1 %v3335_v14 }
 0x1fb   :  { %3370 = vmatprep.subr.bf16.mxu1 %v3369_v38 }
 0x246   :  { %v4465_v46 = vpop.f32.mrb[0].mxu1 }
 0x247   :  { %v2907_v3 = vpop.f32.mrb[1].mxu1  ;;  %v4467_v26 = vpop.f32.mrb[2].mxu0  ;;  %v369_v14 = vadd.f32 1e-08, %v4465_v46 }
 0x248   :  { %5130 = vst [vmem:[#allocation35_spill] sm:$0xff] %v4467_v26  ;;  %v2942_v58 = vpop.f32.mrb[3].mxu0 }
 0x249   :  { %3482 = vrsqrt.f32 %v369_v14  ;;  %v4522_v14 = vld [vmem:[#allocation11 + $0x228] sm:$0xff] }
 0x24a   :  { %5139 = vst [vmem:[#allocation41_spill] sm:$0xff] %v4522_v14  ;;  %v4604_v14 = vld [vmem:[#allocation11 + $0x2d0] sm:$0xff] }
 0x266   :  { %v4469_v2 = vpop.f32.mrb[2].mxu1 }
 0x267   :  { %5131 = vst [vmem:[#allocation36_spill] sm:$0xff] %v4469_v2  ;;  %v4471_v45 = vpop.f32.mrb[3].mxu1  ;;  %v2513_v63 = vpop.f32.mrb[4].mxu0 }
 0x268   :  { %5132 = vst [vmem:[#allocation37_spill] sm:$0xff] %v4471_v45  ;;  %v2514_v40 = vpop.f32.mrb[5].mxu0 }
 0x269   :  { %v2515_v36 = vadd.f32 %v2514_v40, %v2513_v63 }
 0x26a   :  { %v4473_v28 = vpop.f32.mrb[4].mxu1 }
 0x26b   :  { %5133 = vst [vmem:[#allocation38_spill] sm:$0xff] %v4473_v28  ;;  %v2516_v3 = vpop.f32.mrb[6].mxu0  ;;  %v4475_v61 = vpop.f32.mrb[5].mxu1  ;;  %v4556_v28 = vld [vmem:[#allocation11 + $0x3b0] sm:$0xff] }
 0x26c   :  { %5134 = vst [vmem:[#allocation39_spill] sm:$0xff] %v4475_v61  ;;  %v2517_v18 = vpop.f32.mrb[7].mxu0  ;;  %v4554_v61 = vld [vmem:[#allocation11 + $0x238] sm:$0xff]  ;;  %5145 = vst [vmem:[#allocation46_spill] sm:$0xff] %v4556_v28 }
 0x26d   :  { %v2518_v33 = vadd.f32 %v2517_v18, %v2516_v3  ;;  %v5135_v3 = vld [vmem:[#allocation24_spill] sm:$0xff]  ;;  %v5136_v18 = vld [vmem:[#allocation25_spill] sm:$0xff] }
 0x26f   :  { %v2519_v37 = vpop.f32.mrb[8].mxu0 }
 0x270   :  { %v2520_v58 = vpop.f32.mrb[9].mxu0 }
 0x271   :  { %v2521_v16 = vadd.f32 %v2520_v58, %v2519_v37  ;;  %v3483_v37 = vpop.eup %3482 }
 0x273   :  { %v2522_v51 = vpop.f32.mrb[10].mxu0 }
 0x274   :  { %v2523_v24 = vpop.f32.mrb[11].mxu0 }
 0x275   :  { %v2524_v19 = vadd.f32 %v2523_v24, %v2522_v51 }
 0x287   :  { %v2557_v0 = vpop.f32.mrb[6].mxu1 }
 0x288   :  { %v2558_v56 = vpop.f32.mrb[7].mxu1 }
 0x289   :  { %v2559_v20 = vadd.f32 %v2558_v56, %v2557_v0  ;;  %v2601_v27 = vpop.f32.mrb[12].mxu0  ;;  %v4489_v56 = vld [vmem:[#allocation11 + $0x200] sm:$0xff] }
 0x28a   :  { %v2602_v54 = vpop.f32.mrb[13].mxu0 }
 0x28b   :  { %v1172_v49 = vadd.f32 %v2559_v20, %v2515_v36  ;;  %v2603_v11 = vadd.f32 %v2602_v54, %v2601_v27  ;;  %v2560_v55 = vpop.f32.mrb[8].mxu1 }
 0x28c   :  { %v2561_v42 = vpop.f32.mrb[9].mxu1 }
 0x28d   :  { %v1257_v59 = vadd.f32 %v2603_v11, %v1172_v49  ;;  %v2562_v41 = vadd.f32 %v2561_v42, %v2560_v55  ;;  %v2604_v23 = vpop.f32.mrb[14].mxu0  ;;  %v4496_v49 = vld [vmem:[#allocation11 + $0x300] sm:$0xff]  ;;  %v4498_v11 = vld [vmem:[#allocation11 + $0x308] sm:$0xff]  ;;  %v4500_v55 = vld [vmem:[#allocation11 + $0x290] sm:$0xff] }
 0x28e   :  { %v2605_v15 = vpop.f32.mrb[15].mxu0  ;;  %v4502_v42 = vld [vmem:[#allocation11 + $0x298] sm:$0xff] }
 0x28f   :  { %v1177_v21 = vadd.f32 %v2562_v41, %v2518_v33  ;;  %v2606_v48 = vadd.f32 %v2605_v15, %v2604_v23  ;;  %v2563_v43 = vpop.f32.mrb[10].mxu1  ;;  %v1516_v33 = vrot.slane %v5136_v18, %v5135_v3  ;;  %v4504_v41 = vld [vmem:[#allocation11 + $0x210] sm:$0xff]  ;;  %v4506_v23 = vld [vmem:[#allocation11 + $0x218] sm:$0xff] }
 0x290   :  { %v2564_v32 = vpop.f32.mrb[11].mxu1 }
 0x291   :  { %v4477_v12 = vadd.f32 %v2606_v48, %v1177_v21  ;;  %v2565_v34 = vadd.f32 %v2564_v32, %v2563_v43  ;;  %v2607_v52 = vpop.f32.mrb[16].mxu0  ;;  %v1517_v58 = vcombine.high %v1516_v33, %v1516_v33  ;;  %v1524_v46 = vrot.slane %v1516_v33, %v5135_v3  ;;  %v4508_v48 = vld [vmem:[#allocation11 + $0x390] sm:$0xff]  ;;  %v4510_v43 = vld [vmem:[#allocation11 + $0x398] sm:$0xff]  ;;  %v4541_v33 = vld [vmem:[#allocation11 + $0x328] sm:$0xff] }
 0x292   :  { %v2608_v62 = vpop.f32.mrb[17].mxu0  ;;  %v4512_v32 = vld [vmem:[#allocation11 + $0x310] sm:$0xff]  ;;  %5142 = vst [vmem:[#allocation43_spill] sm:$0xff] %v4541_v33 }
 0x293   :  { %v1182_v60 = vadd.f32 %v2565_v34, %v2521_v16  ;;  %v2609_v31 = vadd.f32 %v2608_v62, %v2607_v52  ;;  %v2566_v17 = vpop.f32.mrb[12].mxu1  ;;  %v1452_v16 = vrot.slane %v3483_v37, %v5135_v3  ;;  %v1531_v24 = vrot.slane %v1517_v58, %v5135_v3  ;;  %5137 = vst [vmem:[#allocation25_spill] sm:$0xff] %v4512_v32  ;;  %v4514_v34 = vld [vmem:[#allocation11 + $0x318] sm:$0xff]  ;;  %v4543_v37 = vld [vmem:[#allocation11 + $0x2b0] sm:$0xff] }
 0x294   :  { %v2567_v10 = vpop.f32.mrb[13].mxu1  ;;  %5143 = vst [vmem:[#allocation44_spill] sm:$0xff] %v4543_v37  ;;  %v4545_v58 = vld [vmem:[#allocation11 + $0x2b8] sm:$0xff]  ;;  %v4620_v37 = vld [vmem:[#allocation11 + $0x3d0] sm:$0xff] }
 0x295   :  { %v4480_v25 = vadd.f32 %v2609_v31, %v1182_v60  ;;  %v2568_v50 = vadd.f32 %v2567_v10, %v2566_v17  ;;  %v2610_v38 = vpop.f32.mrb[18].mxu0  ;;  %v1460_v54 = vrot.slane %v1452_v16, %v5135_v3  ;;  %v1453_v21 = vcombine.high %v1452_v16, %v1452_v16  ;;  %v4516_v60 = vld [vmem:[#allocation11 + $0x2a0] sm:$0xff]  ;;  %v4518_v31 = vld [vmem:[#allocation11 + $0x2a8] sm:$0xff]  ;;  %5154 = vst [vmem:[#allocation55_spill] sm:$0xff] %v4620_v37 }
 0x296   :  { %v2611_v4 = vpop.f32.mrb[19].mxu0  ;;  %v4520_v17 = vld [vmem:[#allocation11 + $0x220] sm:$0xff] }
 0x297   :  { %v1187_v63 = vadd.f32 %v2568_v50, %v2524_v19  ;;  %v2612_v40 = vadd.f32 %v2611_v4, %v2610_v38  ;;  %v4491_v19 = vld [vmem:[#allocation11 + $0x208] sm:$0xff]  ;;  %5138 = vst [vmem:[#allocation40_spill] sm:$0xff] %v4520_v17  ;;  %v4524_v10 = vld [vmem:[#allocation11 + $0x3a0] sm:$0xff]  ;;  %v1467_v2 = vrot.slane %v1453_v21, %v5135_v3 }
 0x298   :  { %v4526_v50 = vld [vmem:[#allocation11 + $0x3a8] sm:$0xff]  ;;  %v4528_v38 = vld [vmem:[#allocation11 + $0x320] sm:$0xff] }
 0x299   :  { %v4482_v36 = vadd.f32 %v2612_v40, %v1187_v63  ;;  %5140 = vst [vmem:[#allocation42_spill] sm:$0xff] %v4528_v38  ;;  %v5141_v4 = vld [vmem:[#allocation23_spill] sm:$0xff]  ;;  %v4539_v40 = vld [vmem:[%s5025_s6] ss:$0 sm:$0xff]  ;;  %v4578_v3 = vld [vmem:[#allocation11 + $0x2c8] sm:$0xff] }
 0x29a   :  { %v4531_v63 = vrot.slane %v1524_v46, %v5141_v4  ;;  %v4592_v21 = vld [vmem:[#allocation11 + $0x3c0] sm:$0xff]  ;;  %v4622_v38 = vld [vmem:[#allocation11 + $0x3d8] sm:$0xff] }
 0x29b   :  { %v4600_v17 = vld [vmem:[#allocation11 + $0x340] sm:$0xff] }
 0x29c   :  { %5151 = vst [vmem:[#allocation52_spill] sm:$0xff] %v4600_v17 }
 0x2a7   :  { %v2645_v51 = vpop.f32.mrb[14].mxu1 }
 0x2a8   :  { %v2646_v0 = vpop.f32.mrb[15].mxu1 }
 0x2a9   :  { %v2647_v20 = vadd.f32 %v2646_v0, %v2645_v51  ;;  %v4493_v27 = vpop.f32.mrb[20].mxu0  ;;  %v1471_v51 = vrot.slane %v1460_v54, %v5141_v4  ;;  %v4576_v54 = vld [vmem:[#allocation11 + $0x2c0] sm:$0xff] }
 0x2aa   :  { %v1426_v15 = vpop.f32.mrb[21].mxu0  ;;  %5149 = vst [vmem:[#allocation50_spill] sm:$0xff] %v4576_v54  ;;  %v4639_v54 = vld [vmem:[#allocation11 + $0x2e8] sm:$0xff] }
 0x2ab   :  { %v1342_v52 = vadd.f32 %v2647_v20, %v1257_v59  ;;  %v2648_v62 = vpop.f32.mrb[16].mxu1  ;;  %v4534_v59 = vrot.slane %v1531_v24, %v5141_v4  ;;  %v4552_v20 = vld [vmem:[#allocation11 + $0x230] sm:$0xff]  ;;  %v4569_v24 = vld [vmem:[#allocation11 + $0x338] sm:$0xff]  ;;  %5158 = vst [vmem:[#allocation59_spill] sm:$0xff] %v4639_v54 }
 0x2ac   :  { %v2649_v18 = vpop.f32.mrb[17].mxu1  ;;  %5144 = vst [vmem:[#allocation45_spill] sm:$0xff] %v4552_v20  ;;  %5148 = vst [vmem:[#allocation49_spill] sm:$0xff] %v4569_v24 }
 0x2ad   :  { %v1427_v16 = vadd.f32 %v1426_v15, %v1342_v52  ;;  %v2650_v46 = vadd.f32 %v2649_v18, %v2648_v62  ;;  %v4548_v0 = vpop.f32.mrb[22].mxu0  ;;  %v4565_v62 = vld [vmem:[#allocation11 + $0x3b8] sm:$0xff]  ;;  %v4567_v18 = vld [vmem:[#allocation11 + $0x330] sm:$0xff]  ;;  %v4580_v52 = vld [vmem:[#allocation11 + $0x240] sm:$0xff] }
 0x2ae   :  { %v1436_v45 = vpop.f32.mrb[23].mxu0  ;;  %5146 = vst [vmem:[#allocation47_spill] sm:$0xff] %v4565_v62  ;;  %5147 = vst [vmem:[#allocation48_spill] sm:$0xff] %v4567_v18  ;;  %v4590_v15 = vld [vmem:[#allocation11 + $0x248] sm:$0xff]  ;;  %v4641_v18 = vld [vmem:[#allocation11 + $0x260] sm:$0xff] }
 0x2af   :  { %v1478_v26 = vmul.f32 %v1471_v51, %v1427_v16  ;;  %v1347_v6 = vadd.f32 %v2650_v46, %v4477_v12  ;;  %v2651_v13 = vpop.f32.mrb[18].mxu1  ;;  %5150 = vst [vmem:[#allocation51_spill] sm:$0xff] %v4580_v52  ;;  %v4602_v16 = vld [vmem:[#allocation11 + $0x348] sm:$0xff]  ;;  %v1475_v46 = vrot.slane %v1467_v2, %v5141_v4  ;;  %5159 = vst [vmem:[#allocation60_spill] sm:$0xff] %v4641_v18 }
 0x2b0   :  { %v2652_v5 = vpop.f32.mrb[19].mxu1  ;;  %v4643_v52 = vld [vmem:[#allocation11 + $0x268] sm:$0xff] }
 0x2b1   :  { %v1489_v57 = vadd.f32 %v4539_v40, %v1478_v26  ;;  %v1432_v32 = vadd.f32 %v4493_v27, %v1347_v6  ;;  %v2653_v29 = vadd.f32 %v2652_v5, %v2651_v13  ;;  %v4613_v6 = vld [vmem:[#allocation11 + $0x2d8] sm:$0xff]  ;;  %v4615_v13 = vld [vmem:[#allocation11 + $0x250] sm:$0xff]  ;;  %5160 = vst [vmem:[#allocation61_spill] sm:$0xff] %v4643_v52 }
 0x2b2   :  { %5152 = vst [vmem:[#allocation53_spill] sm:$0xff] %v4615_v13  ;;  %v4617_v27 = vld [vmem:[#allocation11 + $0x258] sm:$0xff] }
 0x2b3   :  { %5153 = vst [vmem:[#allocation54_spill] sm:$0xff] %v4617_v27  ;;  %vm1493_vm13 = vcmp.ge.f32.partialorder %v1489_v57, 0.0  ;;  %v1497_v12 = vmul.f32 0.2, %v1489_v57  ;;  %v1479_v33 = vmul.f32 %v1471_v51, %v1432_v32  ;;  %v1352_v2 = vadd.f32 %v2653_v29, %v4480_v25  ;;  %v2654_v4 = vpop.f32.mrb[20].mxu1  ;;  %v4632_v51 = vld [vmem:[#allocation11 + $0x350] sm:$0xff] }
 0x2b4   :  { %v2655_v26 = vpop.f32.mrb[21].mxu1  ;;  %5155 = vst [vmem:[#allocation56_spill] sm:$0xff] %v4632_v51  ;;  %v4634_v29 = vld [vmem:[#allocation11 + $0x358] sm:$0xff]  ;;  %v4636_v25 = vld [vmem:[#allocation11 + $0x2e0] sm:$0xff] }
 0x2b5   :  { %5156 = vst [vmem:[#allocation57_spill] sm:$0xff] %v4634_v29  ;;  %5157 = vst [vmem:[#allocation58_spill] sm:$0xff] %v4636_v25  ;;  %v1501_v28 = vsel %vm1493_vm13, %v1489_v57, %v1497_v12  ;;  %v1490_v62 = vadd.f32 %v4539_v40, %v1479_v33  ;;  %v1437_v20 = vadd.f32 %v1436_v45, %v1352_v2  ;;  %v4651_v12 = vld [vmem:[#allocation11 + $0x3e0] sm:$0xff]  ;;  %v4653_v45 = vld [vmem:[#allocation11 + $0x3e8] sm:$0xff] }
 0x2b6   :  { %v2656_v5 = vadd.f32 %v2655_v26, %v2654_v4  ;;  %v1505_v24 = vmul.f32 1.4142135, %v1501_v28  ;;  %5161 = vst [vmem:[#allocation62_spill] sm:$0xff] %v4651_v12  ;;  %5162 = vst [vmem:[#allocation63_spill] sm:$0xff] %v4653_v45 }
 0x2b7   :  { %vm1494_vm14 = vcmp.ge.f32.partialorder %v1490_v62, 0.0  ;;  %v1498_v4 = vmul.f32 0.2, %v1490_v62  ;;  %v1480_v33 = vmul.f32 %v1475_v46, %v1437_v20 }
 0x2b8   :  { %v1357_v26 = vadd.f32 %v2656_v5, %v4482_v36  ;;  %v4657_v28 = vmul.f32 %v4531_v63, %v1505_v24 }
 0x2b9   :  { %v1502_v32 = vsel %vm1494_vm14, %v1490_v62, %v1498_v4  ;;  %v1491_v13 = vadd.f32 %v4539_v40, %v1480_v33 }
 0x2ba   :  { %v1442_v27 = vadd.f32 %v4548_v0, %v1357_v26  ;;  %v1506_v20 = vmul.f32 1.4142135, %v1502_v32  ;;  %v1718_v24 = vrot.slane %v4657_v28, 1  ;;  %v4672_v5 = vmul.f32 %v4657_v28, %v4020_v8 }
 0x2bb   :  { %v1698_v2 = vmul.f32 %v4657_v28, %v3988_v47  ;;  %vm1495_vm15 = vcmp.ge.f32.partialorder %v1491_v13, 0.0  ;;  %v1499_v57 = vmul.f32 0.2, %v1491_v13  ;;  %v1694_v4 = vmul.f32 %v4657_v28, %v4081_v39 }
 0x2bc   :  { %v1481_v62 = vmul.f32 %v1475_v46, %v1442_v27  ;;  %v4679_v0 = vmul.f32 %v4531_v63, %v1506_v20  ;;  %v1719_v32 = vsel %vm775_vm4, %v3937_v53, %v1718_v24  ;;  %v1790_v33 = vrot.slane %v4672_v5, 3 }
 0x2bd   :  { %v1742_v26 = vrot.slane %v1698_v2, 4  ;;  %v1503_v36 = vsel %vm1495_vm15, %v1491_v13, %v1499_v57  ;;  %v1792_v18 = vrot.slane %v1719_v32, 3  ;;  %v1730_v52 = vrot.slane %v1694_v4, 2 }
 0x2be   :  { %v1492_v17 = vadd.f32 %v4539_v40, %v1481_v62  ;;  %v1507_v12 = vmul.f32 1.4142135, %v1503_v36  ;;  %v4686_v46 = vrot.slane %v4679_v0, 1  ;;  %v1791_v27 = vsel %vm763_vm5, %v4022_v9, %v1790_v33 }
 0x2bf   :  { %v1699_v63 = vmul.f32 %v4679_v0, %v3974_v30  ;;  %v1743_v2 = vsel %vm843_vm10, %v4047_v22, %v1742_v26  ;;  %v1695_v40 = vmul.f32 %v4679_v0, %v4015_v7  ;;  %v1731_v45 = vsel %vm828_vm12, %v4306_v35, %v1730_v52 }
 0x2c0   :  { %vm1496_vm0 = vcmp.ge.f32.partialorder %v1492_v17, 0.0  ;;  %v1500_v20 = vmul.f32 0.2, %v1492_v17  ;;  %v4697_v13 = vmul.f32 %v4534_v59, %v1507_v12  ;;  %v1721_v57 = vsel %vm775_vm4, %v1718_v24, %v4686_v46 }
 0x2c1   :  { %v1817_v36 = vrot.slane %v4686_v46, 3  ;;  %v1744_v5 = vrot.slane %v1699_v63, 4  ;;  %v4702_v4 = vrot.slane %v1721_v57, 3  ;;  %v1798_v32 = vrot.slane %v1743_v2, 3 }
 0x2c2   :  { %v1504_v62 = vsel %vm1496_vm0, %v1492_v17, %v1500_v20  ;;  %v1732_v25 = vrot.slane %v1695_v40, 2  ;;  %v1795_v54 = vrot.slane %v1731_v45, 3  ;;  %v1691_v2 = vmul.f32 %v4679_v0, %v3981_v44 }
 0x2c3   :  { %v1508_v51 = vmul.f32 1.4142135, %v1504_v62  ;;  %v1745_v29 = vsel %vm843_vm10, %v1742_v26, %v1744_v5  ;;  %v1794_v12 = vsel %vm763_vm5, %v1792_v18, %v4702_v4  ;;  %v1818_v24 = vsel %vm763_vm5, %v4702_v4, %v1817_v36 }
 0x2c4   :  { %v1799_v37 = vrot.slane %v1745_v29, 3  ;;  %v1821_v63 = vrot.slane %v1744_v5, 3  ;;  %1970 = vmatprep.mubr.f32.mxu1 %v1794_v12  ;;  %v1733_v20 = vsel %vm828_vm12, %v1730_v52, %v1732_v25  ;;  %v1819_v26 = vrot.slane %v1732_v25, 3 }
 0x2c5   :  { %v4712_v17 = vmul.f32 %v4534_v59, %v1508_v51  ;;  %1971 = vmatmul.mubr.f32.vlgmr.msra.gmra.mrb[22].mxu1 %v1791_v27  ;;  %v1796_v40 = vrot.slane %v1733_v20, 3  ;;  %v1722_v57 = vrot.slane %v4697_v13, 1  ;;  %v5163_v29 = vpack.c.bf16 %v4491_v19, %v4489_v56 }
 0x2c6   :  { %v1800_v45 = vsel %vm763_vm5, %v1798_v32, %v1799_v37  ;;  %v1822_v18 = vsel %vm763_vm5, %v1799_v37, %v1821_v63  ;;  %1975 = vmatprep.mubr.f32.mxu1 %v1818_v24  ;;  %v1815_v59 = vrot.slane %v1691_v2, 3  ;;  %v1692_v51 = vmul.f32 %v4697_v13, %v4020_v8 }
 0x2c7   :  { %3372 = vmatpush3.bf16.msra.mxu1 %v5163_v29  ;;  %v4724_v52 = vrot.slane %v4712_v17, 1  ;;  %v1700_v25 = vmul.f32 %v4697_v13, %v3988_v47  ;;  %2055 = vmatprep.mubr.f32.mxu0 %v1800_v45  ;;  %v1797_v37 = vsel %vm763_vm5, %v1795_v54, %v1796_v40  ;;  %v5164_v27 = vpack.c.bf16 %v4502_v42, %v4500_v55  ;;  %v5171_v29 = vld [vmem:[#allocation27_spill] sm:$0xff] }
 0x2c8   :  { %v1820_v56 = vsel %vm763_vm5, %v1796_v40, %v1819_v26  ;;  %v1723_v19 = vsel %vm775_vm4, %v3937_v53, %v1722_v57  ;;  %v1750_v36 = vrot.slane %v4657_v28, 5  ;;  %2056 = vmatmul.mubr.f32.vlgmr.msra.gmra.mrb[24].mxu0 %v1797_v37  ;;  %v1816_v5 = vsel %vm763_vm5, %v1790_v33, %v1815_v59 }
 0x2c9   :  { %3374 = vmatprep.subr.bf16.mxu1 %v5164_v27  ;;  %v1725_v47 = vsel %vm775_vm4, %v1722_v57, %v4724_v52  ;;  %v1832_v62 = vrot.slane %v1723_v19, 3  ;;  %v1830_v32 = vrot.slane %v1692_v51, 3  ;;  %v5165_v54 = vpack.c.bf16 %v4498_v11, %v4496_v49  ;;  %2060 = vmatprep.mubr.f32.mxu0 %v1822_v18  ;;  %v5172_v51 = vld [vmem:[#allocation29_spill] sm:$0xff] }
 0x2ca   :  { %v4744_v55 = vrot.slane %v1725_v47, 3  ;;  %v1857_v42 = vrot.slane %v4724_v52, 3  ;;  %v1701_v12 = vmul.f32 %v4712_v17, %v3974_v30  ;;  %v1746_v24 = vrot.slane %v1700_v25, 4  ;;  %1976 = vmatmul.mubr.f32.gmra.mrb[24].mxu1 %v1816_v5  ;;  %v5174_v27 = vld [vmem:[#allocation41_spill] sm:$0xff] }
 0x2cb   :  { %3404 = vmatpush3.bf16.msra.mxu0 %v5165_v54  ;;  %v5166_v33 = vpack.c.bf16 %v4510_v43, %v4508_v48  ;;  %v1831_v63 = vsel %vm763_vm5, %v4022_v9, %v1830_v32  ;;  %v1696_v49 = vmul.f32 %v4697_v13, %v4081_v39  ;;  %v1697_v11 = vmul.f32 %v4712_v17, %v4015_v7 }
 0x2cc   :  { %v1751_v20 = vrot.slane %v4679_v0, 5  ;;  %v5167_v30 = vpack.c.bf16 %v4506_v23, %v4504_v41  ;;  %v1834_v2 = vsel %vm763_vm5, %v1832_v62, %v4744_v55  ;;  %v1858_v48 = vsel %vm763_vm5, %v4744_v55, %v1857_v42  ;;  %2061 = vmatmul.mubr.f32.gmra.mrb[26].mxu0 %v1820_v56  ;;  %v5168_v41 = vld [vmem:[#allocation25_spill] sm:$0xff]  ;;  %v5175_v56 = vld [vmem:[#allocation40_spill] sm:$0xff] }
 0x2cd   :  { %3406 = vmatprep.subr.bf16.mxu0 %v5166_v33  ;;  %v1747_v9 = vsel %vm843_vm10, %v4047_v22, %v1746_v24  ;;  %v1748_v43 = vrot.slane %v1701_v12, 4  ;;  %1980 = vmatprep.mubr.f32.mxu1 %v1834_v2  ;;  %v1734_v7 = vrot.slane %v1696_v49, 2  ;;  %v1736_v45 = vrot.slane %v1697_v11, 2  ;;  %v5180_v49 = vld [vmem:[#allocation42_spill] sm:$0xff] }
 0x2ce   :  { %3376 = vmatpush3.bf16.msra.mxu1 %v5167_v30  ;;  %v1838_v26 = vrot.slane %v1747_v9, 3  ;;  %v1693_v40 = vmul.f32 %v4712_v17, %v3981_v44  ;;  %v5169_v23 = vpack.c.bf16 %v4514_v34, %v5168_v41  ;;  %v5170_v18 = vpack.c.bf16 %v4518_v31, %v4516_v60 }
 0x2cf   :  { %v1749_v57 = vsel %vm843_vm10, %v1746_v24, %v1748_v43  ;;  %v1861_v22 = vrot.slane %v1748_v43, 3  ;;  %v1702_v59 = vmul.f32 %v4657_v28, %v5171_v29  ;;  %v1703_v25 = vmul.f32 %v4679_v0, %v5172_v51  ;;  %1981 = vmatmul.mubr.f32.gmra.mrb[26].mxu1 %v1831_v63  ;;  %v5179_v63 = vld [vmem:[#allocation43_spill] sm:$0xff] }
 0x2d0   :  { %3408 = vmatpush3.bf16.msra.mxu0 %v5169_v23  ;;  %3378 = vmatprep.subr.bf16.mxu1 %v5170_v18  ;;  %v1839_v37 = vrot.slane %v1749_v57, 3  ;;  %v5173_v44 = vpack.c.bf16 %v4526_v50, %v4524_v10  ;;  %v1735_v34 = vsel %vm828_vm12, %v4306_v35, %v1734_v7  ;;  %v1737_v60 = vsel %vm828_vm12, %v1734_v7, %v1736_v45  ;;  %v5177_v50 = vld [vmem:[#allocation44_spill] sm:$0xff]  ;;  %v4808_v43 = vld [vmem:[#allocation11 + $0x360] sm:$0xff]  ;;  %v5185_v57 = vld [vmem:[#allocation26_spill] sm:$0xff] }
 0x2d1   :  { %v1855_v31 = vrot.slane %v1693_v40, 3  ;;  %v5176_v19 = vpack.c.bf16 %v5174_v27, %v5175_v56  ;;  %1985 = vmatprep.mubr.f32.mxu1 %v1858_v48  ;;  %v1835_v5 = vrot.slane %v1735_v34, 3  ;;  %v1836_v47 = vrot.slane %v1737_v60, 3  ;;  %v5184_v23 = vld [vmem:[#allocation31_spill] sm:$0xff]  ;;  %v5189_v34 = vld [vmem:[#allocation50_spill] sm:$0xff]  ;;  %v5191_v27 = vld [vmem:[#allocation49_spill] sm:$0xff] }
 0x2d2   :  { %3410 = vmatprep.subr.bf16.mxu0 %v5173_v44  ;;  %v1760_v62 = vrot.slane %v1702_v59, 6  ;;  %v1761_v54 = vrot.slane %v1703_v25, 6  ;;  %v1840_v42 = vsel %vm763_vm5, %v1838_v26, %v1839_v37  ;;  %v1862_v10 = vsel %vm763_vm5, %v1839_v37, %v1861_v22  ;;  %v4810_v26 = vld [vmem:[#allocation11 + $0x368] sm:$0xff]  ;;  %v5186_v25 = vld [vmem:[#allocation47_spill] sm:$0xff]  ;;  %v5187_v37 = vld [vmem:[#allocation46_spill] sm:$0xff] }
 0x2d3   :  { %3380 = vmatpush3.bf16.msra.mxu1 %v5176_v19  ;;  %v5178_v12 = vpack.c.bf16 %v4545_v58, %v5177_v50  ;;  %v1856_v35 = vsel %vm763_vm5, %v1830_v32, %v1855_v31  ;;  %v1859_v24 = vrot.slane %v1736_v45, 3  ;;  %2065 = vmatprep.mubr.f32.mxu0 %v1840_v42  ;;  %v1837_v33 = vsel %vm763_vm5, %v1835_v5, %v1836_v47  ;;  %v5192_v56 = vld [vmem:[#allocation48_spill] sm:$0xff] }
 0x2d4   :  { %v5181_v11 = vpack.c.bf16 %v5179_v63, %v5180_v49  ;;  %v1762_v30 = vsel %vm864_vm11, %v1760_v62, %v1761_v54  ;;  %v1804_v2 = vrot.slane %v1760_v62, 3  ;;  %v4804_v48 = vsel %vm775_vm4, %v4686_v46, %v3937_v53  ;;  %2066 = vmatmul.mubr.f32.gmra.mrb[28].mxu0 %v1837_v33  ;;  %1986 = vmatmul.mubr.f32.gmra.mrb[28].mxu1 %v1856_v35  ;;  %v5182_v46 = vld [vmem:[#allocation45_spill] sm:$0xff] }
 0x2d5   :  { %3382 = vmatprep.subr.bf16.mxu1 %v5178_v12  ;;  %v1805_v58 = vrot.slane %v1762_v30, 3  ;;  %v1860_v32 = vsel %vm763_vm5, %v1836_v47, %v1859_v24  ;;  %v1810_v9 = vrot.slane %v4804_v48, 3  ;;  %v1752_v7 = vsel %vm749_vm8, %v1750_v36, %v1751_v20  ;;  %2070 = vmatprep.mubr.f32.mxu0 %v1862_v10  ;;  %v4848_v47 = vld [vmem:[#allocation11 + $0x2f8] sm:$0xff]  ;;  %v5195_v24 = vld [vmem:[#allocation51_spill] sm:$0xff]  ;;  %v1672_v30 = vld [vmem:[#allocation11 + $0x3f0] sm:$0xff] }
 0x2d6   :  { %3412 = vmatpush3.bf16.msra.mxu0 %v5181_v11  ;;  %v5183_v45 = vpack.c.bf16 %v4554_v61, %v5182_v46  ;;  %v1801_v40 = vrot.slane %v1750_v36, 3  ;;  %v1802_v41 = vrot.slane %v1752_v7, 3  ;;  %v1763_v18 = vsel %vm864_vm11, %v1761_v54, %v5184_v23  ;;  %v5200_v7 = vld [vmem:[#allocation55_spill] sm:$0xff] }
 0x2d7   :  { %v1706_v22 = vmul.f32 %v4657_v28, %v5185_v57  ;;  %v1806_v59 = vsel %vm763_vm5, %v1804_v2, %v1805_v58  ;;  %v5188_v44 = vpack.c.bf16 %v5186_v25, %v5187_v37  ;;  %v5190_v61 = vpack.c.bf16 %v4578_v3, %v5189_v34  ;;  %v4846_v3 = vld [vmem:[#allocation11 + $0x2f0] sm:$0xff]  ;;  %v1673_v2 = vld [vmem:[#allocation11 + $0x3f8] sm:$0xff]  ;;  %v5205_v34 = vld [vmem:[#allocation59_spill] sm:$0xff] }
 0x2d8   :  { %3384 = vmatpush3.bf16.msra.mxu1 %v5183_v45  ;;  %v1811_v36 = vsel %vm763_vm5, %v4702_v4, %v1810_v9  ;;  %v1825_v60 = vrot.slane %v1763_v18, 3  ;;  %v4839_v31 = vmul.f32 %v4679_v0, %v4020_v8  ;;  %2140 = vmatprep.mubr.f32.mxu1 %v1806_v59  ;;  %v5193_v19 = vpack.c.bf16 %v5191_v27, %v5192_v56  ;;  %v5202_v18 = vld [vmem:[#allocation54_spill] sm:$0xff]  ;;  %v1624_v25 = vld [vmem:[#allocation11 + $0x270] sm:$0xff]  ;;  %v1674_v27 = vld [vmem:[#allocation11 + $0x400] sm:$0xff] }
 0x2d9   :  { %3414 = vmatprep.subr.bf16.mxu0 %v5188_v44  ;;  %3386 = vmatprep.subr.bf16.mxu1 %v5190_v61  ;;  %v3427_v5 = vpack.c.bf16 %v4810_v26, %v4808_v43  ;;  %v4851_v62 = vsel %vm763_vm5, %v1801_v40, %v1802_v41  ;;  %v1807_v4 = vrot.slane %v1706_v22, 3  ;;  %v1823_v54 = vrot.slane %v1751_v20, 3  ;;  %v5203_v22 = vld [vmem:[#allocation53_spill] sm:$0xff]  ;;  %v5206_v61 = vld [vmem:[#allocation58_spill] sm:$0xff]  ;;  %v1675_v56 = vld [vmem:[#allocation11 + $0x408] sm:$0xff] }
 0x2da   :  { %3416 = vmatpush3.bf16.msra.mxu0 %v5193_v19  ;;  %v5194_v42 = vpack.c.bf16 %v4594_v1, %v4592_v21  ;;  %v4859_v10 = vsel %vm763_vm5, %v1805_v58, %v1825_v60  ;;  %v1808_v50 = vrot.slane %v4839_v31, 3  ;;  %v1704_v12 = vmul.f32 %v4697_v13, %v5171_v29  ;;  %v1682_v48 = vld [vmem:[#allocation11 + $0x440] sm:$0xff] }
 0x2db   :  { %2071 = vmatmul.mubr.f32.gmra.mrb[30].mxu0 %v1860_v32  ;;  %v1705_v35 = vmul.f32 %v4712_v17, %v5172_v51  ;;  %v5196_v20 = vpack.c.bf16 %v4590_v15, %v5195_v24  ;;  %v4870_v33 = vsel %vm763_vm5, %v1802_v41, %v1823_v54  ;;  %v4875_v1 = vsel %vm775_vm4, %v4724_v52, %v3937_v53  ;;  %v5198_v53 = vld [vmem:[#allocation52_spill] sm:$0xff] }
 0x2dc   :  { %3418 = vmatprep.subr.bf16.mxu0 %v5194_v42  ;;  %2225 = vmatprep.mubr.f32.mxu0 %v1811_v36  ;;  %v1753_v21 = vrot.slane %v4697_v13, 5  ;;  %v1754_v29 = vrot.slane %v4712_v17, 5  ;;  %v5197_v51 = vpack.c.bf16 %v4613_v6, %v4604_v14  ;;  %v3397_v15 = vpack.c.bf16 %v4848_v47, %v4846_v3  ;;  %v1625_v36 = vld [vmem:[#allocation11 + $0x278] sm:$0xff] }
 0x2dd   :  { %3388 = vmatpush3.bf16.msra.mxu1 %v5196_v20  ;;  %v4887_v63 = vsel %vm763_vm5, %v1807_v4, %v1808_v50  ;;  %v1764_v49 = vrot.slane %v1704_v12, 6  ;;  %v1765_v11 = vrot.slane %v1705_v35, 6  ;;  %v5199_v52 = vpack.c.bf16 %v4602_v16, %v5198_v53  ;;  %v5209_v4 = vld [vmem:[#allocation56_spill] sm:$0xff]  ;;  %v5212_v20 = vld [vmem:[#allocation63_spill] sm:$0xff] }
 0x2de   :  { %3390 = vmatprep.subr.bf16.mxu1 %v5197_v51  ;;  %v1850_v58 = vrot.slane %v4875_v1, 3  ;;  %v1755_v14 = vsel %vm749_vm8, %v1753_v21, %v1754_v29  ;;  %v1841_v6 = vrot.slane %v1753_v21, 3  ;;  %v1708_v32 = vmul.f32 %v4697_v13, %v5185_v57  ;;  %v5211_v35 = vld [vmem:[#allocation28_spill] sm:$0xff]  ;;  %v5213_v21 = vld [vmem:[#allocation62_spill] sm:$0xff]  ;;  %v1686_v1 = vld [vmem:[#allocation11 + $0x460] sm:$0xff] }
 0x2df   :  { %3420 = vmatpush3.bf16.msra.mxu0 %v5199_v52  ;;  %v5201_v46 = vpack.c.bf16 %v4622_v38, %v5200_v7  ;;  %v1766_v45 = vsel %vm864_vm11, %v1764_v49, %v1765_v11  ;;  %v1844_v40 = vrot.slane %v1764_v49, 3  ;;  %v1842_v41 = vrot.slane %v1755_v14, 3  ;;  %v1656_v49 = vld [vmem:[#allocation11 + $0x370] sm:$0xff] }
 0x2e0   :  { %v1767_v16 = vsel %vm864_vm11, %v1765_v11, %v5184_v23  ;;  %v5204_v59 = vpack.c.bf16 %v5202_v18, %v5203_v22  ;;  %v1845_v37 = vrot.slane %v1766_v45, 3  ;;  %v4909_v57 = vsel %vm763_vm5, %v4744_v55, %v1850_v58  ;;  %v5208_v55 = vld [vmem:[#allocation57_spill] sm:$0xff]  ;;  %v1657_v11 = vld [vmem:[#allocation11 + $0x378] sm:$0xff] }
 0x2e1   :  { %3422 = vmatprep.subr.bf16.mxu0 %v5201_v46  ;;  %v1865_v38 = vrot.slane %v1767_v16, 3  ;;  %v4913_v44 = vmul.f32 %v4712_v17, %v4020_v8  ;;  %v5207_v23 = vpack.c.bf16 %v5205_v34, %v5206_v61  ;;  %v3429_v60 = vpack.c.bf16 %v1673_v2, %v1672_v30  ;;  %v5215_v2 = vld [vmem:[#allocation61_spill] sm:$0xff]  ;;  %v5218_v16 = vld [vmem:[#allocation30_spill] sm:$0xff] }
 0x2e2   :  { %3392 = vmatpush3.bf16.msra.mxu1 %v5204_v59  ;;  %v4919_v19 = vsel %vm763_vm5, %v1841_v6, %v1842_v41  ;;  %v1847_v3 = vrot.slane %v1708_v32, 3  ;;  %v1863_v47 = vrot.slane %v1754_v29, 3  ;;  %v5210_v54 = vpack.c.bf16 %v5208_v55, %v5209_v4  ;;  %v1688_v55 = vld [vmem:[#allocation11 + $0x470] sm:$0xff]  ;;  %v1689_v4 = vld [vmem:[#allocation11 + $0x478] sm:$0xff] }
 0x2e3   :  { %3394 = vmatprep.subr.bf16.mxu1 %v5207_v23  ;;  %v1846_v8 = vsel %vm763_vm5, %v1844_v40, %v1845_v37  ;;  %v1866_v42 = vsel %vm763_vm5, %v1845_v37, %v1865_v38  ;;  %v1848_v12 = vrot.slane %v4913_v44, 3  ;;  %v1710_v24 = vmul.f32 %v4657_v28, %v5211_v35  ;;  %v5216_v28 = vld [vmem:[#allocation60_spill] sm:$0xff]  ;;  %v1678_v37 = vld [vmem:[#allocation11 + $0x420] sm:$0xff] }
 0x2e4   :  { %3424 = vmatpush3.bf16.msra.mxu0 %v5210_v54  ;;  %v5214_v51 = vpack.c.bf16 %v5212_v20, %v5213_v21  ;;  %v4933_v29 = vsel %vm763_vm5, %v1842_v41, %v1863_v47  ;;  %v1711_v53 = vmul.f32 %v4679_v0, %v4081_v39  ;;  %v1712_v52 = vmul.f32 %v4697_v13, %v5211_v35  ;;  %v1676_v13 = vld [vmem:[#allocation11 + $0x410] sm:$0xff]  ;;  %v1679_v38 = vld [vmem:[#allocation11 + $0x428] sm:$0xff] }
 0x2e5   :  { %v1713_v30 = vmul.f32 %v4712_v17, %v4081_v39  ;;  %v5217_v14 = vpack.c.bf16 %v5215_v2, %v5216_v28  ;;  %v3399_v6 = vpack.c.bf16 %v1625_v36, %v1624_v25  ;;  %v3433_v32 = vpack.c.bf16 %v1675_v56, %v1674_v27  ;;  %v1677_v17 = vld [vmem:[#allocation11 + $0x418] sm:$0xff]  ;;  %v5219_v23 = vld [vmem:[#allocation32_spill] sm:$0xff]  ;;  %v1680_v27 = vld [vmem:[#allocation11 + $0x430] sm:$0xff] }
 0x2e6   :  { %3426 = vmatprep.subr.bf16.mxu0 %v5214_v51  ;;  %v1849_v7 = vsel %vm763_vm5, %v1847_v3, %v1848_v12  ;;  %v1774_v46 = vrot.slane %v1710_v24, 2  ;;  %v1775_v45 = vrot.slane %v1711_v53, 2  ;;  %v1778_v0 = vrot.slane %v1712_v52, 2  ;;  %v1681_v56 = vld [vmem:[#allocation11 + $0x438] sm:$0xff]  ;;  %v1687_v47 = vld [vmem:[#allocation11 + $0x468] sm:$0xff] }
 0x2e7   :  { %3396 = vmatpush3.bf16.msra.mxu1 %v5217_v14  ;;  %v1779_v40 = vrot.slane %v1713_v30, 2  ;;  %v3431_v39 = vpack.c.bf16 %v1657_v11, %v1656_v49  ;;  %v3437_v25 = vpack.c.bf16 %v1677_v17, %v1676_v13  ;;  %v1828_v36 = vsel %vm763_vm5, %v1810_v9, %v5219_v23  ;;  %v1683_v9 = vld [vmem:[#allocation11 + $0x448] sm:$0xff]  ;;  %v1685_v3 = vld [vmem:[#allocation11 + $0x458] sm:$0xff] }
 0x2e8   :  { %3398 = vmatprep.subr.bf16.mxu1 %v3397_v15  ;;  %3428 = vmatpush3.bf16.msra.mxu0 %v3427_v5  ;;  %v1776_v41 = vsel %vm828_vm12, %v1774_v46, %v1775_v45  ;;  %v4953_v18 = vsel %vm828_vm12, %v1775_v45, %v5218_v16  ;;  %v3449_v31 = vpack.c.bf16 %v1683_v9, %v1682_v48 }
 0x2e9   :  { %3430 = vmatprep.subr.bf16.mxu0 %v3429_v60  ;;  %v1780_v15 = vsel %vm828_vm12, %v1778_v0, %v1779_v40  ;;  %v4958_v22 = vsel %vm828_vm12, %v1779_v40, %v5218_v16  ;;  %v1812_v59 = vrot.slane %v1776_v41, 3  ;;  %v1813_v43 = vrot.slane %v4953_v18, 3 }
 0x2ea   :  { %v1852_v26 = vrot.slane %v1780_v15, 3  ;;  %v1853_v5 = vrot.slane %v4958_v22, 3  ;;  %v3441_v60 = vpack.c.bf16 %v1679_v38, %v1678_v37  ;;  %v3461_v54 = vpack.c.bf16 %v1689_v4, %v1688_v55 }
 0x2eb   :  { %3400 = vmatpush3.bf16.msra.mxu1 %v3399_v6  ;;  %v1814_v34 = vsel %vm763_vm5, %v1812_v59, %v1813_v43 }
 0x2ec   :  { %3434 = vmatprep.subr.bf16.mxu1 %v3433_v32  ;;  %3432 = vmatpush3.bf16.msra.mxu0 %v3431_v39  ;;  %v1854_v61 = vsel %vm763_vm5, %v1852_v26, %v1853_v5 }
 0x2ee   :  { %2141 = vmatmul.mubr.f32.vlgmr.msra.gmra.mrb[30].mxu1 %v4851_v62  ;;  %v5220_v62 = vld [vmem:[#allocation34_spill] sm:$0xff] }
 0x2ef   :  { %2145 = vmatprep.mubr.f32.mxu1 %v4859_v10  ;;  %3436 = vmatpush3.bf16.msra.mxu1 %v3433_v32  ;;  %v1827_v10 = vsel %vm763_vm5, %v1808_v50, %v5220_v62  ;;  %v1684_v50 = vld [vmem:[#allocation11 + $0x450] sm:$0xff] }
 0x2f0   :  { %2226 = vmatmul.mubr.f32.vlgmr.msra.gmra.mrb[32].mxu0 %v4887_v63  ;;  %3438 = vmatprep.subr.bf16.mxu1 %v3437_v25  ;;  %v3445_v63 = vpack.c.bf16 %v1681_v56, %v1680_v27 }
 0x2f1   :  { %2230 = vmatprep.mubr.f32.mxu0 %v1828_v36 }
 0x2f2   :  { %2146 = vmatmul.mubr.f32.gmra.mrb[32].mxu1 %v4870_v33  ;;  %v1868_v33 = vsel %vm763_vm5, %v1850_v58, %v5219_v23  ;;  %v3457_v58 = vpack.c.bf16 %v1687_v47, %v1686_v1 }
 0x2f3   :  { %2150 = vmatprep.mubr.f32.mxu1 %v1846_v8  ;;  %3440 = vmatpush3.bf16.msra.mxu1 %v3437_v25  ;;  %v5221_v8 = vld [vmem:[#allocation33_spill] sm:$0xff] }
 0x2f4   :  { %2231 = vmatmul.mubr.f32.gmra.mrb[34].mxu0 %v1827_v10  ;;  %3442 = vmatprep.subr.bf16.mxu1 %v3441_v60  ;;  %v1829_v44 = vsel %vm763_vm5, %v1813_v43, %v5221_v8 }
 0x2f5   :  { %2235 = vmatprep.mubr.f32.mxu0 %v4909_v57  ;;  %v1867_v57 = vsel %vm763_vm5, %v1848_v12, %v5220_v62 }
 0x2f6   :  { %2151 = vmatmul.mubr.f32.gmra.mrb[34].mxu1 %v4919_v19  ;;  %v3453_v19 = vpack.c.bf16 %v1685_v3, %v1684_v50 }
 0x2f7   :  { %2155 = vmatprep.mubr.f32.mxu1 %v1866_v42  ;;  %3444 = vmatpush3.bf16.msra.mxu1 %v3441_v60  ;;  %v1869_v42 = vsel %vm763_vm5, %v1853_v5, %v5221_v8  ;;  %v5222_v60 = vld [vmem:[#allocation35_spill] sm:$0xff] }
 0x2f8   :  { %2236 = vmatmul.mubr.f32.gmra.mrb[36].mxu0 %v1849_v7  ;;  %3446 = vmatprep.subr.bf16.mxu1 %v3445_v63  ;;  %v457_v27 = vadd.f32 1e-08, %v5222_v60 }
 0x2f9   :  { %2240 = vmatprep.mubr.f32.mxu0 %v1868_v33 }
 0x2fa   :  { %2156 = vmatmul.mubr.f32.gmra.mrb[36].mxu1 %v4933_v29  ;;  %3484 = vrsqrt.f32 %v457_v27 }
 0x2fb   :  { %3448 = vmatpush3.bf16.msra.mxu1 %v3445_v63  ;;  %3051 = vmatprep.mubr.f32.mxu1 %v1814_v34 }
 0x2fc   :  { %2241 = vmatmul.mubr.f32.gmra.mrb[38].mxu0 %v1867_v57  ;;  %3450 = vmatprep.subr.bf16.mxu1 %v3449_v31 }
 0x2ff   :  { %3452 = vmatpush3.bf16.msra.mxu1 %v3449_v31 }
 0x300   :  { %3454 = vmatprep.subr.bf16.mxu1 %v3453_v19 }
 0x303   :  { %3456 = vmatpush3.bf16.msra.mxu1 %v3453_v19 }
 0x304   :  { %3458 = vmatprep.subr.bf16.mxu1 %v3457_v58 }
 0x307   :  { %3460 = vmatpush3.bf16.msra.mxu1 %v3457_v58 }
 0x308   :  { %3462 = vmatprep.subr.bf16.mxu1 %v3461_v54 }
 0x30b   :  { %3464 = vmatpush3.bf16.msra.mxu1 %v3461_v54 }
 0x30e   :  { %3052 = vmatmul.mubr.f32.vlgmr.msra.gmra.mrb[38].mxu1 %v1829_v44  ;;  %v3485_v44 = vpop.eup %3484 }
 0x30f   :  { %3054 = vmatprep.mubr.f32.mxu1 %v1854_v61 }
 0x312   :  { %3055 = vmatmul.mubr.f32.gmra.mrb[40].mxu1 %v1869_v42  ;;  %v5223_v42 = vld [vmem:[#allocation24_spill] sm:$0xff] }
 0x398   :  { %v2709_v12 = vpop.f32.mrb[22].mxu1 }
 0x399   :  { %v2710_v35 = vpop.f32.mrb[23].mxu1 }
 0x39a   :  { %v2711_v24 = vadd.f32 %v2710_v35, %v2709_v12  ;;  %v2338_v12 = vrot.slane %v3485_v44, %v5223_v42 }
 0x39b   :  { %v2753_v20 = vpop.f32.mrb[24].mxu0 }
 0x39c   :  { %v2754_v21 = vpop.f32.mrb[25].mxu0  ;;  %v2346_v35 = vrot.slane %v2338_v12, %v5223_v42 }
 0x39d   :  { %v2755_v51 = vadd.f32 %v2754_v21, %v2753_v20  ;;  %v2712_v49 = vpop.f32.mrb[24].mxu1 }
 0x39e   :  { %v2713_v11 = vpop.f32.mrb[25].mxu1 }
 0x39f   :  { %v2058_v29 = vadd.f32 %v2755_v51, %v2711_v24  ;;  %v2714_v53 = vadd.f32 %v2713_v11, %v2712_v49  ;;  %v2756_v52 = vpop.f32.mrb[26].mxu0  ;;  %v2339_v24 = vcombine.high %v2338_v12, %v2338_v12  ;;  %v5224_v51 = vld [vmem:[#allocation23_spill] sm:$0xff] }
 0x3a0   :  { %v2757_v30 = vpop.f32.mrb[27].mxu0  ;;  %v2357_v49 = vrot.slane %v2346_v35, %v5224_v51 }
 0x3a1   :  { %v2758_v2 = vadd.f32 %v2757_v30, %v2756_v52 }
 0x3a2   :  { %v2715_v28 = vpop.f32.mrb[26].mxu1 }
 0x3a3   :  { %v2716_v14 = vpop.f32.mrb[27].mxu1  ;;  %v2063_v6 = vadd.f32 %v2758_v2, %v2714_v53  ;;  %v2426_v53 = vld [vmem:[%s5028_s9] ss:$0 sm:$0xff]  ;;  %s3712_s9 = smov [#allocation16]  }
 0x3a4   :  { %v2717_v32 = vadd.f32 %v2716_v14, %v2715_v28  ;;  %s2404_s13 = sshll.u32 %s3712_s9, 4  ;;  %s2405_s13 = int_to_ptr.vmem [resolvable:$true] %s2404_s13 }
 0x3a5   :  { %s3662_s19 = scalar_lea.vmem %s2405_s13, 512  ;;  %p3667_p9 = scmp.lt.s32.totalorder %s2405_s13, %s2405_s13 }
 0x3a6   :  { %p3663_p8 = scmp.ne.s32.totalorder %s2405_s13, %s3662_s19  ;;  %p3668_p10 = scmp.lt.s32.totalorder %s3662_s19, %s3662_s19 }
 0x3a7   :  { %v2759_v7 = vpop.f32.mrb[28].mxu0  ;;  %v2718_v46 = vpop.f32.mrb[28].mxu1 }
 0x3a8   :  { %v2760_v45 = vpop.f32.mrb[29].mxu0  ;;  %v2719_v0 = vpop.f32.mrb[29].mxu1  ;;  %p3669_p11 = por %p3668_p10, %p3667_p9 }
 0x3a9   :  { %v2761_v40 = vadd.f32 %v2760_v45, %v2759_v7  ;;  %v2720_v39 = vadd.f32 %v2719_v0, %v2718_v46 }
 0x3aa   :  { %p3670_p12 = pnand %p3669_p11, %p3663_p8 }
 0x3ab   :  { %v2068_v13 = vadd.f32 %v2761_v40, %v2717_v32 }
 0x3ae   :  { %v2762_v17 = vpop.f32.mrb[30].mxu0 }
 0x3af   :  { %v2763_v41 = vpop.f32.mrb[31].mxu0 }
 0x3b0   :  { %v2764_v16 = vadd.f32 %v2763_v41, %v2762_v17 }
 0x3b2   :  { %v2073_v18 = vadd.f32 %v2764_v16, %v2720_v39  ;;  %v5225_v39 = vld [vmem:[#allocation36_spill] sm:$0xff]  ;;  %v5226_v16 = vld [vmem:[#allocation37_spill] sm:$0xff] }
 0x3c1   :  { %v2797_v15 = vpop.f32.mrb[30].mxu1 }
 0x3c2   :  { %v2798_v22 = vpop.f32.mrb[31].mxu1 }
 0x3c3   :  { %v2799_v59 = vadd.f32 %v2798_v22, %v2797_v15  ;;  %v2841_v43 = vpop.f32.mrb[32].mxu0 }
 0x3c4   :  { %v2842_v26 = vpop.f32.mrb[33].mxu0 }
 0x3c5   :  { %v2143_v5 = vadd.f32 %v2799_v59, %v2058_v29  ;;  %v2843_v25 = vadd.f32 %v2842_v26, %v2841_v43  ;;  %v2800_v37 = vpop.f32.mrb[32].mxu1  ;;  %v2353_v29 = vrot.slane %v2339_v24, %v5223_v42 }
 0x3c6   :  { %v2801_v38 = vpop.f32.mrb[33].mxu1 }
 0x3c7   :  { %v2802_v34 = vadd.f32 %v2801_v38, %v2800_v37  ;;  %v2844_v61 = vpop.f32.mrb[34].mxu0  ;;  %v2228_v23 = vadd.f32 %v2843_v25, %v2143_v5  ;;  %v2361_v32 = vrot.slane %v2353_v29, %v5224_v51  ;;  %v5227_v37 = vld [vmem:[#allocation38_spill] sm:$0xff] }
 0x3c8   :  { %v2845_v36 = vpop.f32.mrb[35].mxu0  ;;  %v565_v38 = vmul.f32 0.70710677, %v5227_v37 }
 0x3c9   :  { %v2148_v56 = vadd.f32 %v2802_v34, %v2063_v6  ;;  %v2846_v62 = vadd.f32 %v2845_v36, %v2844_v61  ;;  %v2803_v10 = vpop.f32.mrb[34].mxu1  ;;  %v5228_v61 = vld [vmem:[#allocation39_spill] sm:$0xff] }
 0x3ca   :  { %v2804_v63 = vpop.f32.mrb[35].mxu1 }
 0x3cb   :  { %v2805_v48 = vadd.f32 %v2804_v63, %v2803_v10  ;;  %v2847_v9 = vpop.f32.mrb[36].mxu0  ;;  %v2233_v33 = vadd.f32 %v2846_v62, %v2148_v56 }
 0x3cc   :  { %v2848_v31 = vpop.f32.mrb[37].mxu0 }
 0x3cd   :  { %v2153_v50 = vadd.f32 %v2805_v48, %v2068_v13  ;;  %v2849_v3 = vadd.f32 %v2848_v31, %v2847_v9  ;;  %v2806_v57 = vpop.f32.mrb[36].mxu1  ;;  %v563_v13 = vmul.f32 0.70710677, %v5225_v39 }
 0x3ce   :  { %v2807_v19 = vpop.f32.mrb[37].mxu1 }
 0x3cf   :  { %v2808_v1 = vadd.f32 %v2807_v19, %v2806_v57  ;;  %v2850_v47 = vpop.f32.mrb[38].mxu0  ;;  %v2238_v58 = vadd.f32 %v2849_v3, %v2153_v50 }
 0x3d0   :  { %v2851_v55 = vpop.f32.mrb[39].mxu0 }
 0x3d1   :  { %v2158_v4 = vadd.f32 %v2808_v1, %v2073_v18  ;;  %v2852_v54 = vadd.f32 %v2851_v55, %v2850_v47  ;;  %v562_v18 = vmul.f32 0.70710677, %v5226_v16 }
 0x3d3   :  { %v2243_v8 = vadd.f32 %v2852_v54, %v2158_v4 }
 0x3e1   :  { %v3053_v20 = vpop.f32.mrb[38].mxu1 }
 0x3e2   :  { %v2318_v21 = vadd.f32 %v3053_v20, %v2233_v33  ;;  %v2312_v11 = vpop.f32.mrb[39].mxu1 }
 0x3e3   :  { %v2313_v52 = vadd.f32 %v2312_v11, %v2228_v23  ;;  %v564_v23 = vmul.f32 0.70710677, %v5228_v61 }
 0x3e4   :  { %v2365_v30 = vmul.f32 %v2357_v49, %v2318_v21 }
 0x3e5   :  { %v2364_v2 = vmul.f32 %v2357_v49, %v2313_v52  ;;  %v3056_v28 = vpop.f32.mrb[40].mxu1 }
 0x3e6   :  { %v2376_v14 = vadd.f32 %v2426_v53, %v2365_v30  ;;  %v2328_v6 = vadd.f32 %v3056_v28, %v2243_v8  ;;  %v2322_v7 = vpop.f32.mrb[41].mxu1 }
 0x3e7   :  { %v2375_v46 = vadd.f32 %v2426_v53, %v2364_v2  ;;  %v2323_v45 = vadd.f32 %v2322_v7, %v2238_v58 }
 0x3e8   :  { %vm2380_vm1 = vcmp.ge.f32.partialorder %v2376_v14, 0.0  ;;  %v2384_v0 = vmul.f32 0.2, %v2376_v14  ;;  %v2367_v40 = vmul.f32 %v2361_v32, %v2328_v6 }
 0x3e9   :  { %vm2379_vm2 = vcmp.ge.f32.partialorder %v2375_v46, 0.0  ;;  %v2383_v17 = vmul.f32 0.2, %v2375_v46  ;;  %v2366_v41 = vmul.f32 %v2361_v32, %v2323_v45 }
 0x3ea   :  { %v2388_v15 = vsel %vm2380_vm1, %v2376_v14, %v2384_v0  ;;  %v2378_v22 = vadd.f32 %v2426_v53, %v2367_v40 }
 0x3eb   :  { %v2392_v59 = vadd.f32 %v2388_v15, %v563_v13  ;;  %v2387_v43 = vsel %vm2379_vm2, %v2375_v46, %v2383_v17  ;;  %v2377_v26 = vadd.f32 %v2426_v53, %v2366_v41 }
 0x3ec   :  { %v2391_v5 = vadd.f32 %v2387_v43, %v562_v18  ;;  %vm2382_vm3 = vcmp.ge.f32.partialorder %v2378_v22, 0.0  ;;  %v2386_v25 = vmul.f32 0.2, %v2378_v22 }
 0x3ed   :  { %2396 = vst [vmem:[#allocation16 + $0x8] sm:$0xff] %v2392_v59  ;;  %vm2381_vm4 = vcmp.ge.f32.partialorder %v2377_v26, 0.0  ;;  %v2385_v34 = vmul.f32 0.2, %v2377_v26 }
 0x3ee   :  { %2395 = vst [vmem:[#allocation16] sm:$0xff] %v2391_v5  ;;  %v2390_v36 = vsel %vm2382_vm3, %v2378_v22, %v2386_v25 }
 0x3ef   :  { %v2394_v60 = vadd.f32 %v2390_v36, %v565_v38  ;;  %v2389_v27 = vsel %vm2381_vm4, %v2377_v26, %v2385_v34 }
 0x3f0   :  { %v2393_v56 = vadd.f32 %v2389_v27, %v564_v23 }
 0x3f1   :  { %2398 = vst [vmem:[#allocation16 + $0x18] sm:$0xff] %v2394_v60 }
 0x3f2   :  { %2397 = vst [vmem:[#allocation16 + $0x10] sm:$0xff] %v2393_v56 }
 0x3f3   :  { %3673 = shalt.err (!%p3670_p12)
}
 0x3f4   :  { %s3674_s20 = scalar_lea.hbm %s5030_s11, 512 }
 0x3f5   :  { %p3675_p13 = scmp.ne.s32.totalorder %s5030_s11, %s3674_s20  ;;  %p3678_p0 = scmp.lt.u32.totalorder %s3674_s20, %s5030_s11 }
 0x3f7   :  { %p3680_p1 = pnand %p3678_p0, %p3675_p13 }
 0x3f9   :  { %3683 = shalt.err (!%p3680_p1)
}
 0x3fa   :  { %2410 = dma.vmem_to_hbm [thread:$0]  %s2405_s13, 512, %s5030_s11, [#allocation4], %s3697_s27, %s3697_s27, %s3698_s28  }
 0x3fb   :  { %3694 = dma.done.wait [#allocation4], 512  }
 0x3fc   :  { %3695 = vsyncadd [#allocation4], 4294966784 }
 0x3fd   :  { %2414 = vsyncpa [#allocation3], 1 }
 0x3fe   :  { %2415 = vsyncpa [#allocation6], 1 }
 0x3ff   :  { %2416 = vsyncpa [#allocation9], 1 }
 0x400   :  { %2417 = vsyncpa [#allocation12], 1 }
 0x401   :  { %2418 = vsyncpa [#allocation15], 1 }
 0x402   :  { %2419 = vsyncpa [#allocation4], 1 }

</bundles_post_ra>
